<compile_context>
chip_gen: v7x
topology: tpu7x:2x2x1
jax: 0.10.0
libtpu: 0.0.40
codegen_flags: <defaults>
</compile_context>

<pallas_src>
import functools

import jax
import jax.numpy as jnp
from jax.experimental import pallas as pl
from jax.experimental.pallas import tpu as pltpu

EPS = 1e-5          # PyTorch BatchNorm2d default eps
REDUCTION = 16      # SE hidden size (Linear(channel, reduction))


# ------------------------------------------------------------------ kernel ----

def _ice_se_block_kernel(xpad_ref, mask_ref,
                         w1_ref, s1_ref, b1_ref,
                         w2_ref, s2_ref, b2_ref,
                         wd_ref, sd_ref, bd_ref,
                         fc1w_ref, fc1b_ref, alpha_ref, fc2w_ref, fc2b_ref,
                         o_ref,
                         patch_ref, opad_ref, *, H, W):
    """One batch element of the SE basic block; everything stays in VMEM/vregs.

    Layout: channels on sublanes, flattened zero-padded spatial on lanes
    (row stride Wp = W+2).  A 3x3 tap (kh, kw) is then a constant lane shift of
    kh*Wp + kw, so each conv is a single im2col matmul with K = 9*C.
    Output lanes are h*Wp + w; the 2 junk columns per row are dropped by the
    wrapper (pure slice, no transpose).
    """
    f32 = jnp.float32
    bf16 = jnp.bfloat16
    Wp = W + 2
    SOUT = H * Wp                       # stride-Wp output length (2 junk lanes/row)
    CB = o_ref.shape[0]                 # channel block (= planes = padded inplanes)

    # conv2's padded-activation scratch: halo lanes must stay zero.  The interior
    # [Wp+1, Wp+1+SOUT) is fully overwritten every grid step, so zero only once.
    @pl.when(pl.program_id(0) == 0)
    def _():
        opad_ref[...] = jnp.zeros_like(opad_ref)

    msk = mask_ref[...]                 # (1, SOUT): 1.0 where lane % Wp < W

    def build_patches(src_ref):
        # im2col into the (9*CB, SOUT) patch scratch: tap t = (kh, kw) is the
        # lane window [kh*Wp + kw, kh*Wp + kw + SOUT) of the padded source.
        for t in range(9):
            s = (t // 3) * Wp + (t % 3)
            patch_ref[t * CB:(t + 1) * CB, :] = src_ref[:, s:s + SOUT]

    # ---- conv1 + folded BN + ReLU : one (P, 9C) x (9C, SOUT) matmul ----------
    build_patches(xpad_ref)
    acc1 = jnp.dot(w1_ref[...], patch_ref[...].astype(bf16),
                   preferred_element_type=f32)
    out1 = jnp.maximum(acc1 * s1_ref[...] + b1_ref[...], 0.0)      # (P, SOUT)

    # Place conv1 activations into the padded layout for conv2.  The mask zeroes
    # each row's 2 junk lanes, which land exactly on conv2's interior padding
    # columns, so this single shifted store also writes the zero padding.
    opad_ref[:, Wp + 1:Wp + 1 + SOUT] = out1 * msk

    # ---- conv2 + folded BN (patch scratch reused) -----------------------------
    build_patches(opad_ref)
    acc2 = jnp.dot(w2_ref[...], patch_ref[...].astype(bf16),
                   preferred_element_type=f32)
    out2 = acc2 * s2_ref[...] + b2_ref[...]                        # (P, SOUT) f32

    # ---- SE gate: masked global avg pool -> FC -> PReLU -> FC -> sigmoid -----
    pooled = jnp.sum(out2 * msk, axis=1, keepdims=True) * (1.0 / (H * W))   # (P,1)
    y = jnp.dot(fc1w_ref[...], pooled.astype(bf16),
                preferred_element_type=f32) + fc1b_ref[...]                 # (R,1)
    y = jnp.where(y > 0, y, alpha_ref[...] * y)                             # PReLU
    z = jnp.dot(fc2w_ref[...], y.astype(bf16),
                preferred_element_type=f32) + fc2b_ref[...]                 # (P,1)
    gate = 1.0 / (1.0 + jnp.exp(-z))                                        # exact sigmoid

    # ---- downsample residual (1x1 conv + folded BN) straight from xpad -------
    xs = xpad_ref[:, Wp + 1:Wp + 1 + SOUT]                    # x in stride-Wp layout
    residual = (jnp.dot(wd_ref[...], xs.astype(bf16),
                        preferred_element_type=f32) * sd_ref[...] + bd_ref[...])

    o_ref[...] = jnp.maximum(out2 * gate + residual, 0.0)


# ----------------------------------------------------------------- wrapper ----

def _fold_bn(gamma, beta, mean, var, conv_bias=None):
    """Fold BN(x + conv_bias) into a per-channel affine: y = x*scale + bias."""
    scale = gamma / jnp.sqrt(var + EPS)
    bias = beta - mean * scale
    if conv_bias is not None:
        bias = bias + conv_bias * scale
    return (scale.reshape(-1, 1).astype(jnp.float32),
            bias.reshape(-1, 1).astype(jnp.float32))


def ice_se_basic_block(x_nchw, p):
    """IceSEBasicBlock forward (inference-mode BN).  NCHW in, NCHW out."""
    f32, bf16 = jnp.float32, jnp.bfloat16
    N, Cin, H, W = x_nchw.shape
    P = p["conv1_w"].shape[-1]
    R = p["fc1_w"].shape[-1]

    Hp, Wp = H + 2, W + 2
    SOUT = H * Wp                                   # stride-Wp flattened output length
    # Padded flattened spatial length: must cover the largest tap window
    # (2*Wp + 2 + SOUT) and be lane-tile (128) aligned.
    SPAD = -(-max(Hp * Wp, 2 * Wp + 2 + SOUT) // 128) * 128

    # Pad input channels up to the patch-row block (= planes, multiple of 8) so
    # the im2col writes are sublane-aligned; extra channels/weights are zero.
    assert P % 8 == 0 and Cin <= P, "fused kernel assumes Cin <= planes and planes % 8 == 0"
    Cpad = P

    # x -> zero-padded (N, Cpad, SPAD): channels on sublanes, padded spatial on lanes.
    xp = jnp.pad(x_nchw.astype(f32), ((0, 0), (0, Cpad - Cin), (1, 1), (1, 1)))
    xp = xp.reshape(N, Cpad, Hp * Wp)
    xp = jnp.pad(xp, ((0, 0), (0, 0), (0, SPAD - Hp * Wp)))

    # valid-lane mask for the stride-Wp layout.
    mask = ((jnp.arange(SOUT) % Wp) < W).astype(f32).reshape(1, SOUT)

    # Fold BN (+ conv bias) into per-channel scale/bias, shaped (channels, 1).
    s1, b1 = _fold_bn(p["bn1_g"], p["bn1_b"], p["bn1_m"], p["bn1_v"], p["conv1_b"])
    s2, b2 = _fold_bn(p["bn2_g"], p["bn2_b"], p["bn2_m"], p["bn2_v"], p["conv2_b"])
    sd, bd = _fold_bn(p["bnd_g"], p["bnd_b"], p["bnd_m"], p["bnd_v"])

    # Transposed, im2col'd weights: out^T = W^T @ patches.
    w1 = jnp.zeros((3, 3, Cpad, P), f32).at[:, :, :Cin, :].set(p["conv1_w"])
    w1t = w1.reshape(9 * Cpad, P).T.astype(bf16)           # (P, 9*Cpad)
    w2t = p["conv2_w"].reshape(9 * P, P).T.astype(bf16)    # (P, 9*P)
    wd = jnp.zeros((Cpad, P), f32).at[:Cin, :].set(p["down_w"])
    wdt = wd.T.astype(bf16)                                # (P, Cpad)
    fc1wt = p["fc1_w"].T.astype(bf16)                      # (R, P)
    fc2wt = p["fc2_w"].T.astype(bf16)                      # (P, R)
    fc1b = p["fc1_b"].reshape(-1, 1).astype(f32)
    fc2b = p["fc2_b"].reshape(-1, 1).astype(f32)
    alpha = jnp.asarray(p["prelu_a"], f32).reshape(1, 1)

    kern = functools.partial(_ice_se_block_kernel, H=H, W=W)
    rep = lambda n: (0, 0)                                 # replicated (weight) blocks

    out_s = pl.pallas_call(
        kern,
        out_shape=jax.ShapeDtypeStruct((N, P, SOUT), f32),
        grid_spec=pltpu.PrefetchScalarGridSpec(
            num_scalar_prefetch=0,
            grid=(N,),
            in_specs=[
                pl.BlockSpec((None, Cpad, SPAD), lambda n: (n, 0, 0)),   # xpad
                pl.BlockSpec((1, SOUT), rep),                            # valid-lane mask
                pl.BlockSpec((P, 9 * Cpad), rep),                        # w1t
                pl.BlockSpec((P, 1), rep),                               # s1
                pl.BlockSpec((P, 1), rep),                               # b1
                pl.BlockSpec((P, 9 * P), rep),                           # w2t
                pl.BlockSpec((P, 1), rep),                               # s2
                pl.BlockSpec((P, 1), rep),                               # b2
                pl.BlockSpec((P, Cpad), rep),                            # downsample w^T
                pl.BlockSpec((P, 1), rep),                               # sd
                pl.BlockSpec((P, 1), rep),                               # bd
                pl.BlockSpec((R, P), rep),                               # fc1 w^T
                pl.BlockSpec((R, 1), rep),                               # fc1 b
                pl.BlockSpec((1, 1), rep),                               # prelu alpha
                pl.BlockSpec((P, R), rep),                               # fc2 w^T
                pl.BlockSpec((P, 1), rep),                               # fc2 b
            ],
            out_specs=pl.BlockSpec((None, P, SOUT), lambda n: (n, 0, 0)),
            scratch_shapes=[
                pltpu.VMEM((9 * Cpad, SOUT), f32),   # im2col patches (shared by both convs)
                pltpu.VMEM((P, SPAD), f32),          # zero-padded conv1 activations
            ],
        ),
        compiler_params=pltpu.CompilerParams(
            # init-once halo zeroing relies on sequential grid order
            dimension_semantics=("arbitrary",),
            vmem_limit_bytes=8 * 1024 * 1024,
        ),
    )(xp, mask, w1t, s1, b1, w2t, s2, b2, wdt, sd, bd,
      fc1wt, fc1b, alpha, fc2wt, fc2b)

    # lanes are h*Wp + w; drop the 2 junk columns per row -> NCHW, no transpose.
    return out_s.reshape(N, P, H, Wp)[..., :W]


# --------------------------------------------------------------- reference ----
# Mirrors the kernel's numerics policy (bf16 matmul operands, f32 accumulation,
# exact sigmoid); structure follows the PyTorch module exactly.

def ref_forward(x_nchw, p):
    bf = jnp.bfloat16
    f32 = jnp.float32
    x = jnp.transpose(x_nchw, (0, 2, 3, 1)).astype(f32)
    xb = x.astype(bf)

    def conv3x3(h_bf, w):
        return jax.lax.conv_general_dilated(
            h_bf, w.astype(bf), (1, 1), "SAME",
            dimension_numbers=("NHWC", "HWIO", "NHWC"),
            preferred_element_type=f32)

    def bn(h, g, be, m, v):
        return (h - m) / jnp.sqrt(v + EPS) * g + be

    residual = bn(jnp.einsum("nhwc,cd->nhwd", xb, p["down_w"].astype(bf),
                             preferred_element_type=f32),
                  p["bnd_g"], p["bnd_b"], p["bnd_m"], p["bnd_v"])
    out = jax.nn.relu(bn(conv3x3(xb, p["conv1_w"]) + p["conv1_b"],
                         p["bn1_g"], p["bn1_b"], p["bn1_m"], p["bn1_v"]))
    out = bn(conv3x3(out.astype(bf), p["conv2_w"]) + p["conv2_b"],
             p["bn2_g"], p["bn2_b"], p["bn2_m"], p["bn2_v"])
    # SE
    y = out.mean(axis=(1, 2))
    y = jnp.dot(y.astype(bf), p["fc1_w"].astype(bf),
                preferred_element_type=f32) + p["fc1_b"]
    y = jnp.where(y > 0, y, p["prelu_a"] * y)
    y = jnp.dot(y.astype(bf), p["fc2_w"].astype(bf),
                preferred_element_type=f32) + p["fc2_b"]
    s = jax.nn.sigmoid(y)
    out = jax.nn.relu(out * s[:, None, None, :] + residual)
    return jnp.transpose(out, (0, 3, 1, 2))


# -------------------------------------------------------------------- main ----

if __name__ == "__main__":
    N, Cin, P, H, W = 2, 4, 8, 16, 16        # inplanes=4, planes=8
    R = REDUCTION

    key = jax.random.PRNGKey(0)
    ks = jax.random.split(key, 24)
    f32 = jnp.float32

    x = jax.random.normal(ks[0], (N, Cin, H, W), f32)

    params = {
        # conv1 (3x3, bias=True), HWIO
        "conv1_w": 0.2 * jax.random.normal(ks[1], (3, 3, Cin, P), f32),
        "conv1_b": 0.1 * jax.random.normal(ks[2], (P,), f32),
        "bn1_g": 1.0 + 0.1 * jax.random.normal(ks[3], (P,), f32),
        "bn1_b": 0.1 * jax.random.normal(ks[4], (P,), f32),
        "bn1_m": 0.1 * jax.random.normal(ks[5], (P,), f32),
        "bn1_v": 0.5 + jnp.abs(jax.random.normal(ks[6], (P,), f32)),
        # conv2 (3x3, bias=True)
        "conv2_w": 0.2 * jax.random.normal(ks[7], (3, 3, P, P), f32),
        "conv2_b": 0.1 * jax.random.normal(ks[8], (P,), f32),
        "bn2_g": 1.0 + 0.1 * jax.random.normal(ks[9], (P,), f32),
        "bn2_b": 0.1 * jax.random.normal(ks[10], (P,), f32),
        "bn2_m": 0.1 * jax.random.normal(ks[11], (P,), f32),
        "bn2_v": 0.5 + jnp.abs(jax.random.normal(ks[12], (P,), f32)),
        # downsample: 1x1 conv (no bias) + BN; weight stored as (Cin, Cout)
        "down_w": 0.2 * jax.random.normal(ks[13], (Cin, P), f32),
        "bnd_g": 1.0 + 0.1 * jax.random.normal(ks[14], (P,), f32),
        "bnd_b": 0.1 * jax.random.normal(ks[15], (P,), f32),
        "bnd_m": 0.1 * jax.random.normal(ks[16], (P,), f32),
        "bnd_v": 0.5 + jnp.abs(jax.random.normal(ks[17], (P,), f32)),
        # SE: Linear(P, R) -> PReLU -> Linear(R, P) -> Sigmoid ; weights as (in, out)
        "fc1_w": 0.3 * jax.random.normal(ks[18], (P, R), f32),
        "fc1_b": 0.1 * jax.random.normal(ks[19], (R,), f32),
        "prelu_a": jnp.asarray(0.25, f32),    # PyTorch nn.PReLU() default (shared alpha)
        "fc2_w": 0.3 * jax.random.normal(ks[20], (R, P), f32),
        "fc2_b": 0.1 * jax.random.normal(ks[21], (P,), f32),
    }

    out = jax.block_until_ready(ice_se_basic_block(x, params))
    ref = jax.block_until_ready(ref_forward(x, params))

    assert out.shape == (N, P, H, W), out.shape
    # Shared numerics policy (bf16 matmul operands, f32 accumulation, exact
    # sigmoid); remaining differences are summation-order / BN-fold rounding.
    max_err = float(jnp.max(jnp.abs(out - ref)))
    assert max_err < 5e-3, f"max abs error {max_err}"
    print("KERNEL_OK")
</pallas_src>

<mosaic_0001>
module attributes {stable_mosaic.version = 11 : i64} {
  func.func @_ice_se_block_kernel(%arg0: i32, %arg1: memref<1x8x384xf32, #tpu.memory_space<vmem>>, %arg2: memref<1x288xf32, #tpu.memory_space<vmem>>, %arg3: memref<8x72xbf16, #tpu.memory_space<vmem>>, %arg4: memref<8x1xf32, #tpu.memory_space<vmem>>, %arg5: memref<8x1xf32, #tpu.memory_space<vmem>>, %arg6: memref<8x72xbf16, #tpu.memory_space<vmem>>, %arg7: memref<8x1xf32, #tpu.memory_space<vmem>>, %arg8: memref<8x1xf32, #tpu.memory_space<vmem>>, %arg9: memref<8x8xbf16, #tpu.memory_space<vmem>>, %arg10: memref<8x1xf32, #tpu.memory_space<vmem>>, %arg11: memref<8x1xf32, #tpu.memory_space<vmem>>, %arg12: memref<16x8xbf16, #tpu.memory_space<vmem>>, %arg13: memref<16x1xf32, #tpu.memory_space<vmem>>, %arg14: memref<1x1xf32, #tpu.memory_space<vmem>>, %arg15: memref<8x16xbf16, #tpu.memory_space<vmem>>, %arg16: memref<8x1xf32, #tpu.memory_space<vmem>>, %arg17: memref<1x8x288xf32, #tpu.memory_space<vmem>>, %arg18: memref<72x288xf32, #tpu.memory_space<vmem>>, %arg19: memref<8x384xf32, #tpu.memory_space<vmem>>) attributes {dimension_semantics = [#tpu.dimension_semantics<arbitrary>], iteration_bounds = array<i64: 2>, scalar_prefetch = 0 : i64, scratch_operands = 2 : i64, tpu.core_type = #tpu.core_type<tc>, window_params = [{transform_indices = @transform_0, window_bounds = array<i64: 1, 8, 384>}, {pipeline_mode = #tpu.pipeline_mode<synchronous>, transform_indices = @transform_1, window_bounds = array<i64: 1, 288>}, {pipeline_mode = #tpu.pipeline_mode<synchronous>, transform_indices = @transform_2, window_bounds = array<i64: 8, 72>}, {pipeline_mode = #tpu.pipeline_mode<synchronous>, transform_indices = @transform_3, window_bounds = array<i64: 8, 1>}, {pipeline_mode = #tpu.pipeline_mode<synchronous>, transform_indices = @transform_4, window_bounds = array<i64: 8, 1>}, {pipeline_mode = #tpu.pipeline_mode<synchronous>, transform_indices = @transform_5, window_bounds = array<i64: 8, 72>}, {pipeline_mode = #tpu.pipeline_mode<synchronous>, transform_indices = @transform_6, window_bounds = array<i64: 8, 1>}, {pipeline_mode = #tpu.pipeline_mode<synchronous>, transform_indices = @transform_7, window_bounds = array<i64: 8, 1>}, {pipeline_mode = #tpu.pipeline_mode<synchronous>, transform_indices = @transform_8, window_bounds = array<i64: 8, 8>}, {pipeline_mode = #tpu.pipeline_mode<synchronous>, transform_indices = @transform_9, window_bounds = array<i64: 8, 1>}, {pipeline_mode = #tpu.pipeline_mode<synchronous>, transform_indices = @transform_10, window_bounds = array<i64: 8, 1>}, {pipeline_mode = #tpu.pipeline_mode<synchronous>, transform_indices = @transform_11, window_bounds = array<i64: 16, 8>}, {pipeline_mode = #tpu.pipeline_mode<synchronous>, transform_indices = @transform_12, window_bounds = array<i64: 16, 1>}, {pipeline_mode = #tpu.pipeline_mode<synchronous>, transform_indices = @transform_13, window_bounds = array<i64: 1, 1>}, {pipeline_mode = #tpu.pipeline_mode<synchronous>, transform_indices = @transform_14, window_bounds = array<i64: 8, 16>}, {pipeline_mode = #tpu.pipeline_mode<synchronous>, transform_indices = @transform_15, window_bounds = array<i64: 8, 1>}, {transform_indices = @transform_16, window_bounds = array<i64: 1, 8, 288>}]} {
    %c0_i32 = arith.constant 0 : i32
    %0 = arith.cmpi eq, %arg0, %c0_i32 : i32
    %1 = arith.extui %0 : i1 to i32
    %c0_i32_0 = arith.constant 0 : i32
    %2 = arith.cmpi ne, %1, %c0_i32_0 : i32
    scf.if %2 {
      %cst_119 = arith.constant 0.000000e+00 : f32
      %122 = vector.broadcast %cst_119 : f32 to vector<8x384xf32>
      %c0_120 = arith.constant 0 : index
      %c0_121 = arith.constant 0 : index
      %123 = vector.load %arg19[%c0_120, %c0_121] : memref<8x384xf32, #tpu.memory_space<vmem>>, vector<8x384xf32>
      tpu.vector_store %arg19[%c0_120, %c0_121], %122 {strides = array<i32>} : memref<8x384xf32, #tpu.memory_space<vmem>>, vector<8x384xf32>,
    } else {
    }
    %c0 = arith.constant 0 : index
    %c0_1 = arith.constant 0 : index
    %3 = vector.load %arg2[%c0, %c0_1] : memref<1x288xf32, #tpu.memory_space<vmem>>, vector<1x288xf32>
    %c0_2 = arith.constant 0 : index
    %c0_3 = arith.constant 0 : index
    %c0_4 = arith.constant 0 : index
    %4 = vector.load %arg1[%c0_2, %c0_3, %c0_4] : memref<1x8x384xf32, #tpu.memory_space<vmem>>, vector<1x8x288xf32>
    %5 = vector.shape_cast %4 : vector<1x8x288xf32> to vector<8x288xf32>
    %c0_5 = arith.constant 0 : index
    %c0_6 = arith.constant 0 : index
    %6 = vector.load %arg18[%c0_5, %c0_6] : memref<72x288xf32, #tpu.memory_space<vmem>>, vector<8x288xf32>
    tpu.vector_store %arg18[%c0_5, %c0_6], %5 {strides = array<i32>} : memref<72x288xf32, #tpu.memory_space<vmem>>, vector<8x288xf32>,
    %c0_7 = arith.constant 0 : index
    %c0_8 = arith.constant 0 : index
    %c1 = arith.constant 1 : index
    %7 = vector.load %arg1[%c0_7, %c0_8, %c1] : memref<1x8x384xf32, #tpu.memory_space<vmem>>, vector<1x8x288xf32>
    %8 = vector.shape_cast %7 : vector<1x8x288xf32> to vector<8x288xf32>
    %c8 = arith.constant 8 : index
    %c0_9 = arith.constant 0 : index
    %9 = vector.load %arg18[%c8, %c0_9] : memref<72x288xf32, #tpu.memory_space<vmem>>, vector<8x288xf32>
    tpu.vector_store %arg18[%c8, %c0_9], %8 {strides = array<i32>} : memref<72x288xf32, #tpu.memory_space<vmem>>, vector<8x288xf32>,
    %c0_10 = arith.constant 0 : index
    %c0_11 = arith.constant 0 : index
    %c2 = arith.constant 2 : index
    %10 = vector.load %arg1[%c0_10, %c0_11, %c2] : memref<1x8x384xf32, #tpu.memory_space<vmem>>, vector<1x8x288xf32>
    %11 = vector.shape_cast %10 : vector<1x8x288xf32> to vector<8x288xf32>
    %c16 = arith.constant 16 : index
    %c0_12 = arith.constant 0 : index
    %12 = vector.load %arg18[%c16, %c0_12] : memref<72x288xf32, #tpu.memory_space<vmem>>, vector<8x288xf32>
    tpu.vector_store %arg18[%c16, %c0_12], %11 {strides = array<i32>} : memref<72x288xf32, #tpu.memory_space<vmem>>, vector<8x288xf32>,
    %c0_13 = arith.constant 0 : index
    %c0_14 = arith.constant 0 : index
    %c18 = arith.constant 18 : index
    %13 = vector.load %arg1[%c0_13, %c0_14, %c18] : memref<1x8x384xf32, #tpu.memory_space<vmem>>, vector<1x8x288xf32>
    %14 = vector.shape_cast %13 : vector<1x8x288xf32> to vector<8x288xf32>
    %c24 = arith.constant 24 : index
    %c0_15 = arith.constant 0 : index
    %15 = vector.load %arg18[%c24, %c0_15] : memref<72x288xf32, #tpu.memory_space<vmem>>, vector<8x288xf32>
    tpu.vector_store %arg18[%c24, %c0_15], %14 {strides = array<i32>} : memref<72x288xf32, #tpu.memory_space<vmem>>, vector<8x288xf32>,
    %c0_16 = arith.constant 0 : index
    %c0_17 = arith.constant 0 : index
    %c19 = arith.constant 19 : index
    %16 = vector.load %arg1[%c0_16, %c0_17, %c19] : memref<1x8x384xf32, #tpu.memory_space<vmem>>, vector<1x8x288xf32>
    %17 = vector.shape_cast %16 : vector<1x8x288xf32> to vector<8x288xf32>
    %c32 = arith.constant 32 : index
    %c0_18 = arith.constant 0 : index
    %18 = vector.load %arg18[%c32, %c0_18] : memref<72x288xf32, #tpu.memory_space<vmem>>, vector<8x288xf32>
    tpu.vector_store %arg18[%c32, %c0_18], %17 {strides = array<i32>} : memref<72x288xf32, #tpu.memory_space<vmem>>, vector<8x288xf32>,
    %c0_19 = arith.constant 0 : index
    %c0_20 = arith.constant 0 : index
    %c20 = arith.constant 20 : index
    %19 = vector.load %arg1[%c0_19, %c0_20, %c20] : memref<1x8x384xf32, #tpu.memory_space<vmem>>, vector<1x8x288xf32>
    %20 = vector.shape_cast %19 : vector<1x8x288xf32> to vector<8x288xf32>
    %c40 = arith.constant 40 : index
    %c0_21 = arith.constant 0 : index
    %21 = vector.load %arg18[%c40, %c0_21] : memref<72x288xf32, #tpu.memory_space<vmem>>, vector<8x288xf32>
    tpu.vector_store %arg18[%c40, %c0_21], %20 {strides = array<i32>} : memref<72x288xf32, #tpu.memory_space<vmem>>, vector<8x288xf32>,
    %c0_22 = arith.constant 0 : index
    %c0_23 = arith.constant 0 : index
    %c36 = arith.constant 36 : index
    %22 = vector.load %arg1[%c0_22, %c0_23, %c36] : memref<1x8x384xf32, #tpu.memory_space<vmem>>, vector<1x8x288xf32>
    %23 = vector.shape_cast %22 : vector<1x8x288xf32> to vector<8x288xf32>
    %c48 = arith.constant 48 : index
    %c0_24 = arith.constant 0 : index
    %24 = vector.load %arg18[%c48, %c0_24] : memref<72x288xf32, #tpu.memory_space<vmem>>, vector<8x288xf32>
    tpu.vector_store %arg18[%c48, %c0_24], %23 {strides = array<i32>} : memref<72x288xf32, #tpu.memory_space<vmem>>, vector<8x288xf32>,
    %c0_25 = arith.constant 0 : index
    %c0_26 = arith.constant 0 : index
    %c37 = arith.constant 37 : index
    %25 = vector.load %arg1[%c0_25, %c0_26, %c37] : memref<1x8x384xf32, #tpu.memory_space<vmem>>, vector<1x8x288xf32>
    %26 = vector.shape_cast %25 : vector<1x8x288xf32> to vector<8x288xf32>
    %c56 = arith.constant 56 : index
    %c0_27 = arith.constant 0 : index
    %27 = vector.load %arg18[%c56, %c0_27] : memref<72x288xf32, #tpu.memory_space<vmem>>, vector<8x288xf32>
    tpu.vector_store %arg18[%c56, %c0_27], %26 {strides = array<i32>} : memref<72x288xf32, #tpu.memory_space<vmem>>, vector<8x288xf32>,
    %c0_28 = arith.constant 0 : index
    %c0_29 = arith.constant 0 : index
    %c38 = arith.constant 38 : index
    %28 = vector.load %arg1[%c0_28, %c0_29, %c38] : memref<1x8x384xf32, #tpu.memory_space<vmem>>, vector<1x8x288xf32>
    %29 = vector.shape_cast %28 : vector<1x8x288xf32> to vector<8x288xf32>
    %c64 = arith.constant 64 : index
    %c0_30 = arith.constant 0 : index
    %30 = vector.load %arg18[%c64, %c0_30] : memref<72x288xf32, #tpu.memory_space<vmem>>, vector<8x288xf32>
    tpu.vector_store %arg18[%c64, %c0_30], %29 {strides = array<i32>} : memref<72x288xf32, #tpu.memory_space<vmem>>, vector<8x288xf32>,
    %c0_31 = arith.constant 0 : index
    %c0_32 = arith.constant 0 : index
    %31 = vector.load %arg3[%c0_31, %c0_32] : memref<8x72xbf16, #tpu.memory_space<vmem>>, vector<8x72xbf16>
    %c0_33 = arith.constant 0 : index
    %c0_34 = arith.constant 0 : index
    %32 = vector.load %arg18[%c0_33, %c0_34] : memref<72x288xf32, #tpu.memory_space<vmem>>, vector<72x288xf32>
    %33 = arith.truncf %32 : vector<72x288xf32> to vector<72x288xbf16>
    %cst = arith.constant dense<0.000000e+00> : vector<8x288xf32>
    %34 = tpu.matmul %31, %33, %cst {dimension_numbers = #tpu.dot_dimension_numbers<[1], [0], [0], [1], [0, 0, 1, 1], [], []>} : vector<8x72xbf16>, vector<72x288xbf16>, vector<8x288xf32> -> vector<8x288xf32>
    %c0_35 = arith.constant 0 : index
    %c0_36 = arith.constant 0 : index
    %35 = vector.load %arg4[%c0_35, %c0_36] : memref<8x1xf32, #tpu.memory_space<vmem>>, vector<8x1xf32>
    %36 = vector.broadcast %35 : vector<8x1xf32> to vector<8x288xf32>
    %37 = arith.mulf %34, %36 : vector<8x288xf32>
    %c0_37 = arith.constant 0 : index
    %c0_38 = arith.constant 0 : index
    %38 = vector.load %arg5[%c0_37, %c0_38] : memref<8x1xf32, #tpu.memory_space<vmem>>, vector<8x1xf32>
    %39 = vector.broadcast %38 : vector<8x1xf32> to vector<8x288xf32>
    %40 = arith.addf %37, %39 : vector<8x288xf32>
    %cst_39 = arith.constant 0.000000e+00 : f32
    %41 = vector.broadcast %cst_39 : f32 to vector<8x288xf32>
    %42 = arith.maximumf %40, %41 : vector<8x288xf32>
    %43 = vector.broadcast %3 : vector<1x288xf32> to vector<8x288xf32>
    %44 = arith.mulf %42, %43 : vector<8x288xf32>
    %c0_40 = arith.constant 0 : index
    %c19_41 = arith.constant 19 : index
    %45 = vector.load %arg19[%c0_40, %c19_41] : memref<8x384xf32, #tpu.memory_space<vmem>>, vector<8x288xf32>
    tpu.vector_store %arg19[%c0_40, %c19_41], %44 {strides = array<i32>} : memref<8x384xf32, #tpu.memory_space<vmem>>, vector<8x288xf32>,
    %c0_42 = arith.constant 0 : index
    %c0_43 = arith.constant 0 : index
    %46 = vector.load %arg19[%c0_42, %c0_43] : memref<8x384xf32, #tpu.memory_space<vmem>>, vector<8x288xf32>
    %c0_44 = arith.constant 0 : index
    %c0_45 = arith.constant 0 : index
    %47 = vector.load %arg18[%c0_44, %c0_45] : memref<72x288xf32, #tpu.memory_space<vmem>>, vector<8x288xf32>
    tpu.vector_store %arg18[%c0_44, %c0_45], %46 {strides = array<i32>} : memref<72x288xf32, #tpu.memory_space<vmem>>, vector<8x288xf32>,
    %c0_46 = arith.constant 0 : index
    %c1_47 = arith.constant 1 : index
    %48 = vector.load %arg19[%c0_46, %c1_47] : memref<8x384xf32, #tpu.memory_space<vmem>>, vector<8x288xf32>
    %c8_48 = arith.constant 8 : index
    %c0_49 = arith.constant 0 : index
    %49 = vector.load %arg18[%c8_48, %c0_49] : memref<72x288xf32, #tpu.memory_space<vmem>>, vector<8x288xf32>
    tpu.vector_store %arg18[%c8_48, %c0_49], %48 {strides = array<i32>} : memref<72x288xf32, #tpu.memory_space<vmem>>, vector<8x288xf32>,
    %c0_50 = arith.constant 0 : index
    %c2_51 = arith.constant 2 : index
    %50 = vector.load %arg19[%c0_50, %c2_51] : memref<8x384xf32, #tpu.memory_space<vmem>>, vector<8x288xf32>
    %c16_52 = arith.constant 16 : index
    %c0_53 = arith.constant 0 : index
    %51 = vector.load %arg18[%c16_52, %c0_53] : memref<72x288xf32, #tpu.memory_space<vmem>>, vector<8x288xf32>
    tpu.vector_store %arg18[%c16_52, %c0_53], %50 {strides = array<i32>} : memref<72x288xf32, #tpu.memory_space<vmem>>, vector<8x288xf32>,
    %c0_54 = arith.constant 0 : index
    %c18_55 = arith.constant 18 : index
    %52 = vector.load %arg19[%c0_54, %c18_55] : memref<8x384xf32, #tpu.memory_space<vmem>>, vector<8x288xf32>
    %c24_56 = arith.constant 24 : index
    %c0_57 = arith.constant 0 : index
    %53 = vector.load %arg18[%c24_56, %c0_57] : memref<72x288xf32, #tpu.memory_space<vmem>>, vector<8x288xf32>
    tpu.vector_store %arg18[%c24_56, %c0_57], %52 {strides = array<i32>} : memref<72x288xf32, #tpu.memory_space<vmem>>, vector<8x288xf32>,
    %c0_58 = arith.constant 0 : index
    %c19_59 = arith.constant 19 : index
    %54 = vector.load %arg19[%c0_58, %c19_59] : memref<8x384xf32, #tpu.memory_space<vmem>>, vector<8x288xf32>
    %c32_60 = arith.constant 32 : index
    %c0_61 = arith.constant 0 : index
    %55 = vector.load %arg18[%c32_60, %c0_61] : memref<72x288xf32, #tpu.memory_space<vmem>>, vector<8x288xf32>
    tpu.vector_store %arg18[%c32_60, %c0_61], %54 {strides = array<i32>} : memref<72x288xf32, #tpu.memory_space<vmem>>, vector<8x288xf32>,
    %c0_62 = arith.constant 0 : index
    %c20_63 = arith.constant 20 : index
    %56 = vector.load %arg19[%c0_62, %c20_63] : memref<8x384xf32, #tpu.memory_space<vmem>>, vector<8x288xf32>
    %c40_64 = arith.constant 40 : index
    %c0_65 = arith.constant 0 : index
    %57 = vector.load %arg18[%c40_64, %c0_65] : memref<72x288xf32, #tpu.memory_space<vmem>>, vector<8x288xf32>
    tpu.vector_store %arg18[%c40_64, %c0_65], %56 {strides = array<i32>} : memref<72x288xf32, #tpu.memory_space<vmem>>, vector<8x288xf32>,
    %c0_66 = arith.constant 0 : index
    %c36_67 = arith.constant 36 : index
    %58 = vector.load %arg19[%c0_66, %c36_67] : memref<8x384xf32, #tpu.memory_space<vmem>>, vector<8x288xf32>
    %c48_68 = arith.constant 48 : index
    %c0_69 = arith.constant 0 : index
    %59 = vector.load %arg18[%c48_68, %c0_69] : memref<72x288xf32, #tpu.memory_space<vmem>>, vector<8x288xf32>
    tpu.vector_store %arg18[%c48_68, %c0_69], %58 {strides = array<i32>} : memref<72x288xf32, #tpu.memory_space<vmem>>, vector<8x288xf32>,
    %c0_70 = arith.constant 0 : index
    %c37_71 = arith.constant 37 : index
    %60 = vector.load %arg19[%c0_70, %c37_71] : memref<8x384xf32, #tpu.memory_space<vmem>>, vector<8x288xf32>
    %c56_72 = arith.constant 56 : index
    %c0_73 = arith.constant 0 : index
    %61 = vector.load %arg18[%c56_72, %c0_73] : memref<72x288xf32, #tpu.memory_space<vmem>>, vector<8x288xf32>
    tpu.vector_store %arg18[%c56_72, %c0_73], %60 {strides = array<i32>} : memref<72x288xf32, #tpu.memory_space<vmem>>, vector<8x288xf32>,
    %c0_74 = arith.constant 0 : index
    %c38_75 = arith.constant 38 : index
    %62 = vector.load %arg19[%c0_74, %c38_75] : memref<8x384xf32, #tpu.memory_space<vmem>>, vector<8x288xf32>
    %c64_76 = arith.constant 64 : index
    %c0_77 = arith.constant 0 : index
    %63 = vector.load %arg18[%c64_76, %c0_77] : memref<72x288xf32, #tpu.memory_space<vmem>>, vector<8x288xf32>
    tpu.vector_store %arg18[%c64_76, %c0_77], %62 {strides = array<i32>} : memref<72x288xf32, #tpu.memory_space<vmem>>, vector<8x288xf32>,
    %c0_78 = arith.constant 0 : index
    %c0_79 = arith.constant 0 : index
    %64 = vector.load %arg6[%c0_78, %c0_79] : memref<8x72xbf16, #tpu.memory_space<vmem>>, vector<8x72xbf16>
    %c0_80 = arith.constant 0 : index
    %c0_81 = arith.constant 0 : index
    %65 = vector.load %arg18[%c0_80, %c0_81] : memref<72x288xf32, #tpu.memory_space<vmem>>, vector<72x288xf32>
    %66 = arith.truncf %65 : vector<72x288xf32> to vector<72x288xbf16>
    %cst_82 = arith.constant dense<0.000000e+00> : vector<8x288xf32>
    %67 = tpu.matmul %64, %66, %cst_82 {dimension_numbers = #tpu.dot_dimension_numbers<[1], [0], [0], [1], [0, 0, 1, 1], [], []>} : vector<8x72xbf16>, vector<72x288xbf16>, vector<8x288xf32> -> vector<8x288xf32>
    %c0_83 = arith.constant 0 : index
    %c0_84 = arith.constant 0 : index
    %68 = vector.load %arg7[%c0_83, %c0_84] : memref<8x1xf32, #tpu.memory_space<vmem>>, vector<8x1xf32>
    %69 = vector.broadcast %68 : vector<8x1xf32> to vector<8x288xf32>
    %70 = arith.mulf %67, %69 : vector<8x288xf32>
    %c0_85 = arith.constant 0 : index
    %c0_86 = arith.constant 0 : index
    %71 = vector.load %arg8[%c0_85, %c0_86] : memref<8x1xf32, #tpu.memory_space<vmem>>, vector<8x1xf32>
    %72 = vector.broadcast %71 : vector<8x1xf32> to vector<8x288xf32>
    %73 = arith.addf %70, %72 : vector<8x288xf32>
    %74 = vector.broadcast %3 : vector<1x288xf32> to vector<8x288xf32>
    %75 = arith.mulf %73, %74 : vector<8x288xf32>
    %cst_87 = arith.constant dense<0.000000e+00> : vector<8xf32>
    %76 = vector.multi_reduction <add>, %75, %cst_87 [1] : vector<8x288xf32> to vector<8xf32>
    %77 = vector.shape_cast %76 : vector<8xf32> to vector<8x1xf32>
    %cst_88 = arith.constant 3.906250e-03 : f32
    %78 = vector.broadcast %cst_88 : f32 to vector<8x1xf32>
    %79 = arith.mulf %77, %78 : vector<8x1xf32>
    %c0_89 = arith.constant 0 : index
    %c0_90 = arith.constant 0 : index
    %80 = vector.load %arg12[%c0_89, %c0_90] : memref<16x8xbf16, #tpu.memory_space<vmem>>, vector<16x8xbf16>
    %81 = arith.truncf %79 : vector<8x1xf32> to vector<8x1xbf16>
    %cst_91 = arith.constant dense<0.000000e+00> : vector<16x1xf32>
    %82 = tpu.matmul %80, %81, %cst_91 {dimension_numbers = #tpu.dot_dimension_numbers<[1], [0], [0], [1], [0, 0, 1, 1], [], []>} : vector<16x8xbf16>, vector<8x1xbf16>, vector<16x1xf32> -> vector<16x1xf32>
    %c0_92 = arith.constant 0 : index
    %c0_93 = arith.constant 0 : index
    %83 = vector.load %arg13[%c0_92, %c0_93] : memref<16x1xf32, #tpu.memory_space<vmem>>, vector<16x1xf32>
    %84 = arith.addf %82, %83 : vector<16x1xf32>
    %cst_94 = arith.constant 0.000000e+00 : f32
    %85 = vector.broadcast %cst_94 : f32 to vector<16x1xf32>
    %86 = arith.cmpf ogt, %84, %85 : vector<16x1xf32>
    %c0_95 = arith.constant 0 : index
    %c0_96 = arith.constant 0 : index
    %87 = vector.load %arg14[%c0_95, %c0_96] : memref<1x1xf32, #tpu.memory_space<vmem>>, vector<1x1xf32>
    %88 = vector.broadcast %87 : vector<1x1xf32> to vector<16x1xf32>
    %89 = arith.mulf %88, %84 : vector<16x1xf32>
    %90 = arith.select %86, %84, %89 : vector<16x1xi1>, vector<16x1xf32>
    %c0_97 = arith.constant 0 : index
    %c0_98 = arith.constant 0 : index
    %91 = vector.load %arg15[%c0_97, %c0_98] : memref<8x16xbf16, #tpu.memory_space<vmem>>, vector<8x16xbf16>
    %92 = arith.truncf %90 : vector<16x1xf32> to vector<16x1xbf16>
    %cst_99 = arith.constant dense<0.000000e+00> : vector<8x1xf32>
    %93 = tpu.matmul %91, %92, %cst_99 {dimension_numbers = #tpu.dot_dimension_numbers<[1], [0], [0], [1], [0, 0, 1, 1], [], []>} : vector<8x16xbf16>, vector<16x1xbf16>, vector<8x1xf32> -> vector<8x1xf32>
    %c0_100 = arith.constant 0 : index
    %c0_101 = arith.constant 0 : index
    %94 = vector.load %arg16[%c0_100, %c0_101] : memref<8x1xf32, #tpu.memory_space<vmem>>, vector<8x1xf32>
    %95 = arith.addf %93, %94 : vector<8x1xf32>
    %cst_102 = arith.constant 0.000000e+00 : f32
    %96 = vector.broadcast %cst_102 : f32 to vector<8x1xf32>
    %97 = arith.subf %96, %95 : vector<8x1xf32>
    %98 = math.exp %97 : vector<8x1xf32>
    %cst_103 = arith.constant 1.000000e+00 : f32
    %99 = vector.broadcast %cst_103 : f32 to vector<8x1xf32>
    %100 = arith.addf %99, %98 : vector<8x1xf32>
    %cst_104 = arith.constant 1.000000e+00 : f32
    %101 = vector.broadcast %cst_104 : f32 to vector<8x1xf32>
    %102 = arith.divf %101, %100 : vector<8x1xf32>
    %c0_105 = arith.constant 0 : index
    %c0_106 = arith.constant 0 : index
    %c19_107 = arith.constant 19 : index
    %103 = vector.load %arg1[%c0_105, %c0_106, %c19_107] : memref<1x8x384xf32, #tpu.memory_space<vmem>>, vector<1x8x288xf32>
    %104 = vector.shape_cast %103 : vector<1x8x288xf32> to vector<8x288xf32>
    %c0_108 = arith.constant 0 : index
    %c0_109 = arith.constant 0 : index
    %105 = vector.load %arg9[%c0_108, %c0_109] : memref<8x8xbf16, #tpu.memory_space<vmem>>, vector<8x8xbf16>
    %106 = arith.truncf %104 : vector<8x288xf32> to vector<8x288xbf16>
    %cst_110 = arith.constant dense<0.000000e+00> : vector<8x288xf32>
    %107 = tpu.matmul %105, %106, %cst_110 {dimension_numbers = #tpu.dot_dimension_numbers<[1], [0], [0], [1], [0, 0, 1, 1], [], []>} : vector<8x8xbf16>, vector<8x288xbf16>, vector<8x288xf32> -> vector<8x288xf32>
    %c0_111 = arith.constant 0 : index
    %c0_112 = arith.constant 0 : index
    %108 = vector.load %arg10[%c0_111, %c0_112] : memref<8x1xf32, #tpu.memory_space<vmem>>, vector<8x1xf32>
    %109 = vector.broadcast %108 : vector<8x1xf32> to vector<8x288xf32>
    %110 = arith.mulf %107, %109 : vector<8x288xf32>
    %c0_113 = arith.constant 0 : index
    %c0_114 = arith.constant 0 : index
    %111 = vector.load %arg11[%c0_113, %c0_114] : memref<8x1xf32, #tpu.memory_space<vmem>>, vector<8x1xf32>
    %112 = vector.broadcast %111 : vector<8x1xf32> to vector<8x288xf32>
    %113 = arith.addf %110, %112 : vector<8x288xf32>
    %114 = vector.broadcast %102 : vector<8x1xf32> to vector<8x288xf32>
    %115 = arith.mulf %73, %114 : vector<8x288xf32>
    %116 = arith.addf %115, %113 : vector<8x288xf32>
    %cst_115 = arith.constant 0.000000e+00 : f32
    %117 = vector.broadcast %cst_115 : f32 to vector<8x288xf32>
    %118 = arith.maximumf %116, %117 : vector<8x288xf32>
    %c0_116 = arith.constant 0 : index
    %c0_117 = arith.constant 0 : index
    %c0_118 = arith.constant 0 : index
    %119 = vector.load %arg17[%c0_116, %c0_117, %c0_118] : memref<1x8x288xf32, #tpu.memory_space<vmem>>, vector<1x8x288xf32>
    %120 = vector.shape_cast %119 : vector<1x8x288xf32> to vector<8x288xf32>
    %121 = vector.shape_cast %118 : vector<8x288xf32> to vector<1x8x288xf32>
    tpu.vector_store %arg17[%c0_116, %c0_117, %c0_118], %121 {strides = array<i32>} : memref<1x8x288xf32, #tpu.memory_space<vmem>>, vector<1x8x288xf32>,
    return
  }
  func.func @transform_0(%arg0: i32) -> (i32, i32, i32) {
    %c0_i32 = arith.constant 0 : i32
    %c0_i32_0 = arith.constant 0 : i32
    %c0_i32_1 = arith.constant 0 : i32
    return %arg0, %c0_i32, %c0_i32_0 : i32, i32, i32
  }
  func.func @transform_1(%arg0: i32) -> (i32, i32) {
    %c0_i32 = arith.constant 0 : i32
    %c0_i32_0 = arith.constant 0 : i32
    %c0_i32_1 = arith.constant 0 : i32
    return %c0_i32, %c0_i32_0 : i32, i32
  }
  func.func @transform_2(%arg0: i32) -> (i32, i32) {
    %c0_i32 = arith.constant 0 : i32
    %c0_i32_0 = arith.constant 0 : i32
    %c0_i32_1 = arith.constant 0 : i32
    return %c0_i32, %c0_i32_0 : i32, i32
  }
  func.func @transform_3(%arg0: i32) -> (i32, i32) {
    %c0_i32 = arith.constant 0 : i32
    %c0_i32_0 = arith.constant 0 : i32
    %c0_i32_1 = arith.constant 0 : i32
    return %c0_i32, %c0_i32_0 : i32, i32
  }
  func.func @transform_4(%arg0: i32) -> (i32, i32) {
    %c0_i32 = arith.constant 0 : i32
    %c0_i32_0 = arith.constant 0 : i32
    %c0_i32_1 = arith.constant 0 : i32
    return %c0_i32, %c0_i32_0 : i32, i32
  }
  func.func @transform_5(%arg0: i32) -> (i32, i32) {
    %c0_i32 = arith.constant 0 : i32
    %c0_i32_0 = arith.constant 0 : i32
    %c0_i32_1 = arith.constant 0 : i32
    return %c0_i32, %c0_i32_0 : i32, i32
  }
  func.func @transform_6(%arg0: i32) -> (i32, i32) {
    %c0_i32 = arith.constant 0 : i32
    %c0_i32_0 = arith.constant 0 : i32
    %c0_i32_1 = arith.constant 0 : i32
    return %c0_i32, %c0_i32_0 : i32, i32
  }
  func.func @transform_7(%arg0: i32) -> (i32, i32) {
    %c0_i32 = arith.constant 0 : i32
    %c0_i32_0 = arith.constant 0 : i32
    %c0_i32_1 = arith.constant 0 : i32
    return %c0_i32, %c0_i32_0 : i32, i32
  }
  func.func @transform_8(%arg0: i32) -> (i32, i32) {
    %c0_i32 = arith.constant 0 : i32
    %c0_i32_0 = arith.constant 0 : i32
    %c0_i32_1 = arith.constant 0 : i32
    return %c0_i32, %c0_i32_0 : i32, i32
  }
  func.func @transform_9(%arg0: i32) -> (i32, i32) {
    %c0_i32 = arith.constant 0 : i32
    %c0_i32_0 = arith.constant 0 : i32
    %c0_i32_1 = arith.constant 0 : i32
    return %c0_i32, %c0_i32_0 : i32, i32
  }
  func.func @transform_10(%arg0: i32) -> (i32, i32) {
    %c0_i32 = arith.constant 0 : i32
    %c0_i32_0 = arith.constant 0 : i32
    %c0_i32_1 = arith.constant 0 : i32
    return %c0_i32, %c0_i32_0 : i32, i32
  }
  func.func @transform_11(%arg0: i32) -> (i32, i32) {
    %c0_i32 = arith.constant 0 : i32
    %c0_i32_0 = arith.constant 0 : i32
    %c0_i32_1 = arith.constant 0 : i32
    return %c0_i32, %c0_i32_0 : i32, i32
  }
  func.func @transform_12(%arg0: i32) -> (i32, i32) {
    %c0_i32 = arith.constant 0 : i32
    %c0_i32_0 = arith.constant 0 : i32
    %c0_i32_1 = arith.constant 0 : i32
    return %c0_i32, %c0_i32_0 : i32, i32
  }
  func.func @transform_13(%arg0: i32) -> (i32, i32) {
    %c0_i32 = arith.constant 0 : i32
    %c0_i32_0 = arith.constant 0 : i32
    %c0_i32_1 = arith.constant 0 : i32
    return %c0_i32, %c0_i32_0 : i32, i32
  }
  func.func @transform_14(%arg0: i32) -> (i32, i32) {
    %c0_i32 = arith.constant 0 : i32
    %c0_i32_0 = arith.constant 0 : i32
    %c0_i32_1 = arith.constant 0 : i32
    return %c0_i32, %c0_i32_0 : i32, i32
  }
  func.func @transform_15(%arg0: i32) -> (i32, i32) {
    %c0_i32 = arith.constant 0 : i32
    %c0_i32_0 = arith.constant 0 : i32
    %c0_i32_1 = arith.constant 0 : i32
    return %c0_i32, %c0_i32_0 : i32, i32
  }
  func.func @transform_16(%arg0: i32) -> (i32, i32, i32) {
    %c0_i32 = arith.constant 0 : i32
    %c0_i32_0 = arith.constant 0 : i32
    %c0_i32_1 = arith.constant 0 : i32
    return %arg0, %c0_i32, %c0_i32_0 : i32, i32, i32
  }
}

</mosaic_0001>

<bundles_post_ra>
// kernel: tpu_custom_call.1
= control target key start
LH: loop header
LB: loop body
LE: loop exit
PB: predicated region body
PF: predicated region fallthrough
CT: control target
= control target key end

     0   :  { %s2286_s0 = inlined_call_operand.vmem [shape: f32[2,8,384], index: 0, kind: input, shape index: {}]   ;;  %s2287_s1 = inlined_call_operand.vmem [shape: f32[1,288], index: 1, kind: input, shape index: {}]   ;;  %s2288_s2 = inlined_call_operand.vmem [shape: bf16[8,72], index: 2, kind: input, shape index: {}]   ;;  %s2289_s3 = inlined_call_operand.vmem [shape: f32[8,1], index: 3, kind: input, shape index: {}]   ;;  %s2290_s4 = inlined_call_operand.vmem [shape: f32[8,1], index: 4, kind: input, shape index: {}]   ;;  %s2291_s5 = inlined_call_operand.vmem [shape: bf16[8,72], index: 5, kind: input, shape index: {}]   ;;  %s2292_s6 = inlined_call_operand.vmem [shape: f32[8,1], index: 6, kind: input, shape index: {}]   ;;  %s2293_s7 = inlined_call_operand.vmem [shape: f32[8,1], index: 7, kind: input, shape index: {}]   ;;  %s2294_s8 = inlined_call_operand.vmem [shape: bf16[8,8], index: 8, kind: input, shape index: {}]   ;;  %s2295_s9 = inlined_call_operand.vmem [shape: f32[8,1], index: 9, kind: input, shape index: {}]   ;;  %s2296_s10 = inlined_call_operand.vmem [shape: f32[8,1], index: 10, kind: input, shape index: {}]   ;;  %s2297_s11 = inlined_call_operand.vmem [shape: bf16[16,8], index: 11, kind: input, shape index: {}]   ;;  %s2298_s12 = inlined_call_operand.vmem [shape: f32[16,1], index: 12, kind: input, shape index: {}]   ;;  %s2299_s13 = inlined_call_operand.<no memory space> [shape: f32[1,1], index: 13, kind: input, shape index: {}]   ;;  %s2300_s14 = inlined_call_operand.vmem [shape: bf16[8,16], index: 14, kind: input, shape index: {}]   ;;  %s2301_s15 = inlined_call_operand.vmem [shape: f32[8,1], index: 15, kind: input, shape index: {}]   ;;  %s2302_s16 = inlined_call_operand.hbm [shape: f32[2,8,288], index: 16, kind: output, shape index: {}]  }
   0x1   :  { %2313 = sst [smem:[#allocation10_spill]] %s2286_s0  ;;  %v21_v0 = vstv %s2299_s13 }
   0x2   :  { %2314 = sst [smem:[#allocation11_spill]] %s2287_s1  ;;  %22 = vst [vmem:[#allocation4] sm:$0x1] %v21_v0 }
   0x3   :  { %23 = vsyncpa [#allocation6], 0 }
   0x4   :  { %25 = vsyncpa [#allocation6 + $0x1], 0  ;;  %s1892_s23 = smov 0   ;;  %s1894_s24 = smov 0  }
   0x5   :  { %s1896_s25 = smov 0   ;;  %s1898_s26 = smov 0  }
   0x6 LB: > { %2315 = sst [smem:[#allocation8_spill]] %s1784_s25  ;;  %s1913_s13 = sadd.s32 4294967295, %s1788_s26   ;;  %s1788_s26 = sphi %s1898_s26, %s2330_s26   ;;  %s1784_s25 = sphi %s1896_s25, %s2327_s25   ;;  %s1780_s24 = sphi %s1894_s24, %s2329_s24   ;;  %s1776_s23 = sphi %s1892_s23, %s2328_s23  }
   0x7   : > { %s1578_s27 = sadd.s32 4294967294, %s1788_s26   ;;  %s1917_s28 = sadd.s32 1, %s1788_s26  }
   0x8   : > { %s379_s29 = sadd.s32 1, %s1784_s25  ;;  %s376_s30 = ssub.s32 %s1788_s26, %s1917_s28 }
   0x9   : > { %p389_p0 = scmp.ne.s32.totalorder %s1784_s25, %s1780_s24  ;;  %p377_p1 = scmp.eq.s32.totalorder %s376_s30, 0 }
   0xa   : > { %p390_p2 = scmp.eq.s32.totalorder %s1913_s13, 1  ;;  %p395_p3 = scmp.ne.s32.totalorder %s1780_s24, %s1776_s23 }
   0xb   : > { %p396_p4 = scmp.eq.s32.totalorder %s1578_s27, 1  ;;  %p1581_p7 = scmp.ge.s32.totalorder %s1788_s26, 1 }
   0xc   : > { %s1928_s0 = scalar_select %p377_p1, %s1784_s25, %s379_s29  }
   0xd   : > { %p1930_p5 = por %p390_p2, %p389_p0  ;;  %p1934_p6 = por %p396_p4, %p395_p3 }
   0xe   : > { %2316 = sst [smem:[#allocation9_spill]] %s1928_s0  ;;  %p467_p8 = scmp.lt.s32.totalorder %s1788_s26, 3 }
  0x10   : > { %p468_p9 = pnand %p1581_p7, %p467_p8 }
  0x11   : > { %s2304_s19 = sand.u32 (!%p468_p9), 1, %s1780_s24   ;;  %p517_p10 = scmp.lt.s32.totalorder (!%p468_p9), %s1913_s13, 1 }
  0x12   : > { %471 = sbr.rel (%p468_p9) target bundleno = 1702 (0x6a6), region = 84  ;;  %s2319_s30 = sld [smem:[#allocation10_spill]] (!%p468_p9) }
  0x13   : > { %s1664_s20 = smul.u32 (!%p468_p9), 24, %s2304_s19  ;;  %p1583_p11 = scmp.ne.s32.totalorder (!%p468_p9), %s1913_s13, 0 }
  0x15   : > { %s1948_s25 = scalar_lea.vmem (!%p468_p9), [#allocation5], %s1664_s20 }
  0x19   : > { %s518_s21 = scalar_select %p517_p10, %s1913_s13, 1 }
  0x1a   : > { %526 = sbr.rel (%p1583_p11) target bundleno = 33 (0x21), region = 88  ;;  %v1790_v1 = vmov (!%p1583_p11), 0.0  }
  0x1b   : > { %s1665_s22 = smul.u32 24, %s518_s21  ;;  %527 = vst [vmem:[#allocation3] sm:$0xff] (!%p1583_p11), %v1790_v1  ;;  %529 = vst [vmem:[#allocation3 + $0x10] sm:$0xff] (!%p1583_p11), %v1790_v1 }
  0x1d   : > { %s521_s0 = scalar_lea.vmem %s2319_s30, %s1665_s22 }
  0x21 PF: > { %v1951_v2 = vld [vmem:[%s521_s0 + $0x8] sm:$0xff]  ;;  %v1953_v3 = vld [vmem:[%s521_s0] sm:$0xff]  ;;  %s1791_s19 = smov 127   ;;  %v1959_v4 = vld [vmem:[%s521_s0 + $0x10] sm:$0xff]  ;;  %vm536_vm0 = vcmask 261120   ;;  %v1792_v5 = vmov 0.0  }
  0x22   : > { %546 = vrot.lane.b32.xlu0 %v1951_v2, %s1791_s19  ;;  %544 = vrot.lane.b32.xlu1 %v1953_v3, %s1791_s19  ;;  %537 = vst.msk [vmem:[#allocation2 + $0x10] sm:$0xff] %vm536_vm0, %v1959_v4  ;;  %s1793_s20 = smov 126   ;;  %s2309_s21 = smov 110   ;;  %v1799_v6 = vmov 0   ;;  %vm1801_vm1 = vmmov 0   ;;  %v844_v7 = vld [vmem:[%s2289_s3] sm:$0xff] }
  0x23   : > { %1618 = vmatprep.subr.bf16.mxu1 %v1792_v5  ;;  %s1795_s0 = smov 109   ;;  %s2305_s22 = smov 108   ;;  %795 = vmatprep.mubr.bf16.mxu0 %v1799_v6  ;;  %v853_v8 = vld [vmem:[%s2290_s4] sm:$0xff]  ;;  %vm550_vm2 = vcmask 1039360   ;;  %vm571_vm3 = vcmask 1031168   ;;  %vm592_vm4 = vcmask 900096  }
  0x24   : > { %s2307_s27 = smov 92   ;;  %s2311_s29 = smov 91   ;;  %1719 = vset.pattern.permute.xlu0 %v1799_v6  ;;  %1720 = vset.pattern.permute.xlu1 %v1799_v6  ;;  %vm613_vm5 = vcmask 891904   ;;  %vm634_vm6 = vcmask 883712   ;;  %vm655_vm7 = vcmask 752640   ;;  %vm676_vm8 = vcmask 744448  }
  0x25   : > { %s1800_s30 = smov 90   ;;  %1628 = vmatprep.mubr.msk.bf16.mxu1 %vm1801_vm1, %v1792_v5  ;;  %vm697_vm9 = vcmask 736256   ;;  %vm753_vm10 = vcmask 1043456   ;;  %vm749_vm11 = vcmask 588800   ;;  %s2320_s1 = sld [smem:[#allocation11_spill]]  ;;  %vm899_vm12 = vcmask 1047704  }
  0x26   : > { %548 = vrot.lane.b32.xlu0 %v1959_v4, %s1791_s19  ;;  %567 = vrot.lane.b32.xlu1 %v1951_v2, %s1793_s20  ;;  %vm893_vm13 = vcmask 154624   ;;  %vm902_vm14 = vcmask 416768   ;;  %vm1243_vm15 = vcmask 64512  }
  0x29   : > { %v709_v19 = vld [vmem:[#allocation2 + $0x10] sm:$0xff] }
  0x2a   : > { %569 = vrot.lane.b32.xlu0 %v1959_v4, %s1793_s20  ;;  %588 = vrot.lane.b32.xlu1 %v1951_v2, %s2309_s21 }
  0x2e   : > { %590 = vrot.lane.b32.xlu0 %v1959_v4, %s2309_s21  ;;  %565 = vrot.lane.b32.xlu1 %v1953_v3, %s1793_s20 }
  0x32   : > { %586 = vrot.lane.b32.xlu0 %v1953_v3, %s2309_s21  ;;  %609 = vrot.lane.b32.xlu1 %v1951_v2, %s1795_s0  ;;  %s1802_s21 = smov 19  }
  0x36   : > { %611 = vrot.lane.b32.xlu0 %v1959_v4, %s1795_s0  ;;  %630 = vrot.lane.b32.xlu1 %v1951_v2, %s2305_s22 }
  0x3a   : > { %632 = vrot.lane.b32.xlu0 %v1959_v4, %s2305_s22  ;;  %607 = vrot.lane.b32.xlu1 %v1953_v3, %s1795_s0 }
  0x3e   : > { %628 = vrot.lane.b32.xlu0 %v1953_v3, %s2305_s22  ;;  %651 = vrot.lane.b32.xlu1 %v1951_v2, %s2307_s27  ;;  %s2321_s22 = smov 110  }
  0x42   : > { %653 = vrot.lane.b32.xlu0 %v1959_v4, %s2307_s27  ;;  %672 = vrot.lane.b32.xlu1 %v1951_v2, %s2311_s29 }
  0x46   : > { %674 = vrot.lane.b32.xlu0 %v1959_v4, %s2311_s29  ;;  %649 = vrot.lane.b32.xlu1 %v1953_v3, %s2307_s27  ;;  %s2322_s27 = smov 92  }
  0x4a   : > { %670 = vrot.lane.b32.xlu0 %v1953_v3, %s2311_s29  ;;  %691 = vrot.lane.b32.xlu1 %v1953_v3, %s1800_s30  ;;  %s2323_s29 = smov 108  }
  0x4e   : > { %693 = vrot.lane.b32.xlu0 %v1951_v2, %s1800_s30  ;;  %695 = vrot.lane.b32.xlu1 %v1959_v4, %s1800_s30 }
  0x52   : > { %847 = vperm.xlu0 %1719, %v844_v7   ;;  %856 = vperm.xlu1 %1720, %v853_v8  }
  0x94   : > { %v547_v9 = vpop.permute.xlu0 %546  ;;  %v545_v10 = vpop.permute.xlu1 %544 }
  0x95   : > { %v551_v11 = vsel %vm550_vm2, %v545_v10, %v547_v9 }
  0x96   : > { %v734_v16 = vpack.c.bf16 %v551_v11, %v1953_v3 }
  0x98   : > { %v549_v12 = vpop.permute.xlu0 %548  ;;  %v568_v13 = vpop.permute.xlu1 %567 }
  0x99   : > { %v552_v14 = vsel %vm550_vm2, %v547_v9, %v549_v12  ;;  %558 = vst.msk [vmem:[#allocation2 + $0x28] sm:$0xff] %vm536_vm0, %v549_v12 }
  0x9a   : > { %v735_v15 = vpack.c.bf16 %v552_v14, %v1951_v2 }
  0x9c   : > { %v570_v17 = vpop.permute.xlu0 %569  ;;  %v589_v18 = vpop.permute.xlu1 %588  ;;  %763 = vmatprep.subr.bf16.mxu0 %v735_v15 }
  0x9d   : > { %579 = vst.msk [vmem:[#allocation2 + $0x40] sm:$0xff] %vm536_vm0, %v570_v17  ;;  %764 = vmatpush1.bf16.msra.mxu0 %v734_v16  ;;  %v573_v23 = vsel %vm571_vm3, %v568_v13, %v570_v17  ;;  %v866_v17 = vlaneseq }
  0xa0   : > { %v591_v20 = vpop.permute.xlu0 %590  ;;  %v566_v21 = vpop.permute.xlu1 %565  ;;  %v712_v22 = vld [vmem:[#allocation2 + $0x28] sm:$0xff] }
  0xa1   : > { %v594_v24 = vsel %vm592_vm4, %v589_v18, %v591_v20  ;;  %600 = vst.msk [vmem:[#allocation2 + $0x58] sm:$0xff] %vm536_vm0, %v591_v20  ;;  %v736_v25 = vpack.c.bf16 %v712_v22, %v709_v19  ;;  %v572_v29 = vsel %vm571_vm3, %v566_v21, %v568_v13  ;;  %v706_v13 = vld [vmem:[%s2288_s2] sm:$0xf] }
  0xa2   : > { %v738_v26 = vpack.c.bf16 %v594_v24, %v573_v23  ;;  %v530_v23 = vld [vmem:[%s2320_s1] sm:$0x7] }
  0xa3   : > { %1619 = vmatpush3.bf16.msra.mxu1 %v736_v25 }
  0xa4   : > { %v587_v27 = vpop.permute.xlu0 %586  ;;  %v610_v28 = vpop.permute.xlu1 %609  ;;  %1620 = vmatprep.subr.bf16.mxu1 %v1792_v5  ;;  %765 = vmatprep.subr.bf16.mxu0 %v738_v26  ;;  %v715_v34 = vld [vmem:[#allocation2 + $0x40] sm:$0xff] }
  0xa5   : > { %v593_v30 = vsel %vm592_vm4, %v587_v27, %v589_v18  ;;  %v867_v18 = vshrl.u32 %v866_v17, 7 }
  0xa6   : > { %v737_v31 = vpack.c.bf16 %v593_v30, %v572_v29 }
  0xa7   : > { %v868_v20 = vsub.s32 0, %v867_v18  ;;  %v872_v24 = vsub.s32 1, %v867_v18 }
  0xa8   : > { %v612_v32 = vpop.permute.xlu0 %611  ;;  %v631_v33 = vpop.permute.xlu1 %630  ;;  %v718_v35 = vld [vmem:[#allocation2 + $0x58] sm:$0xff]  ;;  %766 = vmatpush1.bf16.msra.mxu0 %v737_v31 }
  0xa9   : > { %621 = vst.msk [vmem:[#allocation2 + $0x70] sm:$0xff] %vm536_vm0, %v612_v32  ;;  %v739_v36 = vpack.c.bf16 %v718_v35, %v715_v34  ;;  %v615_v39 = vsel %vm613_vm5, %v610_v28, %v612_v32  ;;  %v2064_v31 = vrot.slane %v530_v23, %v868_v20 }
  0xab   : > { %1621 = vmatpush3.bf16.msra.mxu1 %v739_v36  ;;  %v876_v36 = vsub.s32 2, %v867_v18 }
  0xac   : > { %v633_v37 = vpop.permute.xlu0 %632  ;;  %v608_v38 = vpop.permute.xlu1 %607  ;;  %1622 = vmatprep.subr.bf16.mxu1 %v1792_v5 }
  0xad   : > { %v636_v40 = vsel %vm634_vm6, %v631_v33, %v633_v37  ;;  %642 = vst.msk [vmem:[#allocation2 + $0x88] sm:$0xff] %vm536_vm0, %v633_v37  ;;  %v614_v44 = vsel %vm613_vm5, %v608_v38, %v610_v28 }
  0xae   : > { %v741_v41 = vpack.c.bf16 %v636_v40, %v615_v39 }
  0xb0   : > { %v629_v42 = vpop.permute.xlu0 %628  ;;  %v652_v43 = vpop.permute.xlu1 %651  ;;  %767 = vmatprep.subr.bf16.mxu0 %v741_v41  ;;  %v721_v49 = vld [vmem:[#allocation2 + $0x70] sm:$0xff] }
  0xb1   : > { %v635_v45 = vsel %vm634_vm6, %v629_v42, %v631_v33  ;;  %v2066_v33 = vrot.slane %v530_v23, %v872_v24 }
  0xb2   : > { %v740_v46 = vpack.c.bf16 %v635_v45, %v614_v44  ;;  %v2070_v44 = vrot.slane %v530_v23, %v876_v36 }
  0xb4   : > { %v654_v47 = vpop.permute.xlu0 %653  ;;  %v673_v48 = vpop.permute.xlu1 %672  ;;  %v724_v50 = vld [vmem:[#allocation2 + $0x88] sm:$0xff]  ;;  %768 = vmatpush1.bf16.msra.mxu0 %v740_v46 }
  0xb5   : > { %663 = vst.msk [vmem:[#allocation2 + $0xa0] sm:$0xff] %vm536_vm0, %v654_v47  ;;  %v742_v51 = vpack.c.bf16 %v724_v50, %v721_v49  ;;  %v657_v54 = vsel %vm655_vm7, %v652_v43, %v654_v47 }
  0xb7   : > { %1623 = vmatpush3.bf16.msra.mxu1 %v742_v51 }
  0xb8   : > { %v675_v52 = vpop.permute.xlu0 %674  ;;  %v650_v53 = vpop.permute.xlu1 %649  ;;  %1624 = vmatprep.subr.bf16.mxu1 %v1792_v5 }
  0xb9   : > { %v678_v55 = vsel %vm676_vm8, %v673_v48, %v675_v52  ;;  %684 = vst.msk [vmem:[#allocation2 + $0xb8] sm:$0xff] %vm536_vm0, %v675_v52  ;;  %v656_v59 = vsel %vm655_vm7, %v650_v53, %v652_v43 }
  0xba   : > { %v744_v56 = vpack.c.bf16 %v678_v55, %v657_v54  ;;  %v1206_v55 = vld [vmem:[%s2292_s6] sm:$0xff] }
  0xbc   : > { %v671_v57 = vpop.permute.xlu0 %670  ;;  %v692_v58 = vpop.permute.xlu1 %691  ;;  %769 = vmatprep.subr.bf16.mxu0 %v744_v56  ;;  %v727_v0 = vld [vmem:[#allocation2 + $0xa0] sm:$0xff] }
  0xbd   : > { %v677_v60 = vsel %vm676_vm8, %v671_v57, %v673_v48  ;;  %v1215_v56 = vld [vmem:[%s2293_s7] sm:$0xff]  ;;  %v1361_v57 = vpack.c.bf16 %v1953_v3, %v1953_v3 }
  0xbe   : > { %v743_v61 = vpack.c.bf16 %v677_v60, %v656_v59  ;;  %v1363_v59 = vpack.c.bf16 %v1959_v4, %v1959_v4  ;;  %v1469_v60 = vld [vmem:[%s2295_s9] sm:$0xff] }
  0xbf   : > { %v1478_v3 = vld [vmem:[%s2296_s10] sm:$0xff] }
  0xc0   : > { %v694_v62 = vpop.permute.xlu0 %693  ;;  %v696_v63 = vpop.permute.xlu1 %695  ;;  %v730_v1 = vld [vmem:[#allocation2 + $0xb8] sm:$0xff]  ;;  %770 = vmatpush1.bf16.msra.mxu0 %v743_v61 }
  0xc1   : > { %v698_v7 = vsel %vm697_vm9, %v692_v58, %v694_v62  ;;  %v699_v8 = vsel %vm697_vm9, %v694_v62, %v696_v63  ;;  %705 = vst.msk [vmem:[#allocation2 + $0xd0] sm:$0xff] %vm536_vm0, %v696_v63  ;;  %v745_v9 = vpack.c.bf16 %v730_v1, %v727_v0  ;;  %v1362_v58 = vpack.c.bf16 %v1951_v2, %v1951_v2 }
  0xc2   : > { %v747_v10 = vpack.c.bf16 %v699_v8, %v699_v8  ;;  %v746_v11 = vpack.c.bf16 %v698_v7, %v698_v7 }
  0xc3   : > { %1625 = vmatpush3.bf16.msra.mxu1 %v745_v9 }
  0xc4   : > { %1626 = vmatprep.subr.bf16.mxu1 %v1792_v5  ;;  %1584 = vmatprep.subr.msk.bf16.mxu0 %vm753_vm10, %v747_v10  ;;  %v755_v12 = vsel %vm753_vm10, %v746_v11, 0 }
  0xc5   : > { %772 = vmatpush1.bf16.msra.mxu0 %v755_v12 }
  0xc8   : > { %v733_v14 = vld [vmem:[#allocation2 + $0xd0] sm:$0xff]  ;;  %1585 = vmatmul.mubr.msk.bf16.vlgmr.msra.gmra.mrb[0].mxu0 %vm749_vm11, %v706_v13 }
  0xc9   : > { %v748_v15 = vpack.c.bf16 %v733_v14, %v733_v14  ;;  %1157 = vmatprep.mubr.bf16.mxu0 %v1799_v6 }
  0xcb   : > { %v761_v16 = vsel %vm753_vm10, %v748_v15, 0 }
  0xcc   : > { %1627 = vmatpush3.bf16.msra.mxu1 %v761_v16 }
  0xcd   : > { %1632 = vmatprep.subr.bf16.mxu1 %v1792_v5 }
  0xcf   : > { %1629 = vmatmul.mubr.msk.bf16.vlgmr.msra.gmra.mrb[0].mxu1 %vm749_vm11, %v706_v13 }
  0xd0   : > { %1642 = vmatprep.mubr.msk.bf16.mxu1 %vm1801_vm1, %v1792_v5 }
  0xd1   : > { %v848_v19 = vpop.permute.xlu0 %847  ;;  %v857_v22 = vpop.permute.xlu1 %856 }
 0x19b   : > { %v797_v21 = vpop.f32.mrb[0].mxu0 }
 0x19c   : > { %v850_v25 = vmul.f32 %v848_v19, %v797_v21  ;;  %v799_v26 = vpop.f32.mrb[1].mxu0 }
 0x19d   : > { %v851_v27 = vmul.f32 %v848_v19, %v799_v26  ;;  %v801_v28 = vpop.f32.mrb[2].mxu0 }
 0x19e   : > { %v859_v29 = vadd.f32 %v857_v22, %v850_v25  ;;  %v802_v30 = vpop.f32.mrb[3].mxu0 }
 0x19f   : > { %v860_v32 = vadd.f32 %v857_v22, %v851_v27 }
 0x1a0   : > { %v862_v34 = vmax.f32 %v859_v29, 0.0 }
 0x1a1   : > { %v863_v35 = vmax.f32 %v860_v32, 0.0 }
 0x1a2   : > { %v838_v37 = vpop.f32.mrb[0].mxu1  ;;  %v881_v38 = vmul.f32 %v2064_v31, %v862_v34 }
 0x1a3   : > { %v852_v39 = vmul.f32 %v848_v19, %v838_v37  ;;  %v882_v40 = vmul.f32 %v2066_v33, %v863_v35  ;;  %v1630_v41 = vpop.f32.mrb[1].mxu1 }
 0x1a4   : > { %887 = vrot.lane.b32.xlu1 %v881_v38, %s1802_s21  ;;  %v841_v42 = vpop.f32.mrb[2].mxu1 }
 0x1a5   : > { %v861_v43 = vadd.f32 %v857_v22, %v852_v39  ;;  %889 = vrot.lane.b32.xlu0 %v882_v40, %s1802_s21  ;;  %v1631_v45 = vpop.f32.mrb[3].mxu1 }
 0x1a7   : > { %v864_v46 = vmax.f32 %v861_v43, 0.0 }
 0x1a9   : > { %v883_v47 = vmul.f32 %v2070_v44, %v864_v46 }
 0x1ab   : > { %891 = vrot.lane.b32.xlu1 %v883_v47, %s1802_s21  ;;  %s2324_s21 = smov 91  }
 0x216   : > { %v888_v48 = vpop.permute.xlu1 %887 }
 0x217   : > { %900 = vst.msk [vmem:[#allocation3] sm:$0xff] %vm899_vm12, %v888_v48  ;;  %v890_v49 = vpop.permute.xlu0 %889 }
 0x218   : > { %v2073_v50 = vsel %vm893_vm13, %v888_v48, %v890_v49 }
 0x21d   : > { %v892_v51 = vpop.permute.xlu1 %891 }
 0x21e   : > { %v2075_v52 = vld [vmem:[#allocation3] sm:$0xff]  ;;  %v895_v53 = vsel %vm893_vm13, %v890_v49, %v892_v51 }
 0x21f   : > { %903 = vst.msk [vmem:[#allocation3 + $0x10] sm:$0xff] %vm902_vm14, %v895_v53  ;;  %936 = vrot.lane.b32.xlu1 %v2075_v52, %s1793_s20  ;;  %916 = vrot.lane.b32.xlu0 %v2075_v52, %s1791_s19 }
 0x223   : > { %976 = vrot.lane.b32.xlu1 %v2075_v52, %s1795_s0  ;;  %956 = vrot.lane.b32.xlu0 %v2075_v52, %s2321_s22 }
 0x226   : > { %v906_v54 = vld [vmem:[#allocation3 + $0x10] sm:$0xff] }
 0x227   : > { %909 = vst.msk [vmem:[#allocation2 + $0x10] sm:$0xff] %vm536_vm0, %v906_v54  ;;  %1016 = vrot.lane.b32.xlu1 %v2075_v52, %s2322_s27  ;;  %996 = vrot.lane.b32.xlu0 %v2075_v52, %s2323_s29 }
 0x22b   : > { %1056 = vrot.lane.b32.xlu1 %v2075_v52, %s1800_s30  ;;  %1036 = vrot.lane.b32.xlu0 %v2075_v52, %s2324_s21 }
 0x22e   : > { %v1073_v20 = vld [vmem:[#allocation2 + $0x10] sm:$0xff] }
 0x22f   : > { %918 = vrot.lane.b32.xlu0 %v2073_v50, %s1791_s19  ;;  %920 = vrot.lane.b32.xlu1 %v906_v54, %s1791_s19  ;;  %s1519_s19 = sshll.u32 %s1948_s25, 4  ;;  %s2240_s19 = int_to_ptr.vmem [resolvable:$true] %s1519_s19 }
 0x233   : > { %940 = vrot.lane.b32.xlu0 %v906_v54, %s1793_s20  ;;  %938 = vrot.lane.b32.xlu1 %v2073_v50, %s1793_s20 }
 0x237   : > { %960 = vrot.lane.b32.xlu0 %v906_v54, %s2321_s22  ;;  %958 = vrot.lane.b32.xlu1 %v2073_v50, %s2321_s22 }
 0x23b   : > { %980 = vrot.lane.b32.xlu0 %v906_v54, %s1795_s0  ;;  %978 = vrot.lane.b32.xlu1 %v2073_v50, %s1795_s0 }
 0x23f   : > { %1000 = vrot.lane.b32.xlu0 %v906_v54, %s2323_s29  ;;  %998 = vrot.lane.b32.xlu1 %v2073_v50, %s2323_s29 }
 0x243   : > { %1020 = vrot.lane.b32.xlu0 %v906_v54, %s2322_s27  ;;  %1018 = vrot.lane.b32.xlu1 %v2073_v50, %s2322_s27  ;;  %s1803_s27 = smov [#allocation5]  }
 0x247   : > { %1040 = vrot.lane.b32.xlu0 %v906_v54, %s2324_s21  ;;  %1038 = vrot.lane.b32.xlu1 %v2073_v50, %s2324_s21  ;;  %s1666_s21 = smul.u32 384, %s1913_s13  ;;  %s2325_s13 = sand.u32 1, %s1780_s24  }
 0x248   : > { %s1505_s29 = scalar_lea.sflag [#allocation6], %s2325_s13 }
 0x249   : > { %s2238_s22 = scalar_lea.hbm %s2302_s16, %s1666_s21 }
 0x24b   : > { %1058 = vrot.lane.b32.xlu0 %v2073_v50, %s1800_s30  ;;  %1060 = vrot.lane.b32.xlu1 %v906_v54, %s1800_s30  ;;  %s1726_s30 = scalar_lea.vmem %s2240_s19, 384 }
 0x24c   : > { %p1727_p12 = scmp.ne.s32.totalorder %s2240_s19, %s1726_s30 }
 0x24e   : > { %p1728_p13 = pnand %p1727_p12, %p1930_p5 }
 0x24f   : > { %1209 = vperm.xlu0 %1719, %v1206_v55   ;;  %1218 = vperm.xlu1 %1720, %v1215_v56  }
 0x250   : > { %p1729_p0 = pneg %p1728_p13 }
 0x253   : > { %1367 = vrot.lane.b32.xlu1 %v1361_v57, %s1795_s0 }
 0x257   : > { %1369 = vrot.lane.b32.xlu1 %v1362_v58, %s1795_s0 }
 0x25b   : > { %1371 = vrot.lane.b32.xlu1 %v1363_v59, %s1795_s0  ;;  %s1730_s0 = sshll.u32 %s1803_s27, 4  ;;  %s1731_s0 = int_to_ptr.vmem [resolvable:$false] %s1730_s0 }
 0x25c   : > { %s1732_s21 = scalar_lea.vmem %s1731_s0, 768  ;;  %p1733_p1 = scmp.lt.s32.totalorder %s2240_s19, %s1731_s0 }
 0x25d   : > { %p1734_p2 = scmp.lt.s32.totalorder %s1732_s21, %s1726_s30 }
 0x25f   : > { %1472 = vperm.xlu1 %1720, %v1469_v60   ;;  %p1735_p3 = por %p1734_p2, %p1733_p1 }
 0x261   : > { %p1736_p4 = pnand %p1735_p3, %p1729_p0 }
 0x263   : > { %1481 = vperm.xlu1 %1720, %v1478_v3  }
 0x291   : > { %v917_v61 = vpop.permute.xlu0 %916  ;;  %v937_v62 = vpop.permute.xlu1 %936 }
 0x295   : > { %v957_v2 = vpop.permute.xlu0 %956  ;;  %v977_v63 = vpop.permute.xlu1 %976 }
 0x299   : > { %v997_v0 = vpop.permute.xlu0 %996  ;;  %v1017_v1 = vpop.permute.xlu1 %1016 }
 0x29d   : > { %v1037_v7 = vpop.permute.xlu0 %1036  ;;  %v2139_v4 = vpop.permute.xlu1 %1056 }
 0x2a1   : > { %v919_v8 = vpop.permute.xlu0 %918  ;;  %v921_v9 = vpop.permute.xlu1 %920 }
 0x2a2   : > { %v922_v10 = vsel %vm550_vm2, %v917_v61, %v919_v8  ;;  %v923_v11 = vsel %vm550_vm2, %v919_v8, %v921_v9  ;;  %929 = vst.msk [vmem:[#allocation2 + $0x28] sm:$0xff] %vm536_vm0, %v921_v9 }
 0x2a3   : > { %v1099_v12 = vpack.c.bf16 %v923_v11, %v2073_v50  ;;  %v1098_v13 = vpack.c.bf16 %v922_v10, %v2075_v52 }
 0x2a5   : > { %v941_v14 = vpop.permute.xlu0 %940  ;;  %v939_v15 = vpop.permute.xlu1 %938  ;;  %1125 = vmatprep.subr.bf16.mxu0 %v1099_v12 }
 0x2a6   : > { %949 = vst.msk [vmem:[#allocation2 + $0x40] sm:$0xff] %vm536_vm0, %v941_v14  ;;  %v942_v16 = vsel %vm571_vm3, %v937_v62, %v939_v15  ;;  %v943_v17 = vsel %vm571_vm3, %v939_v15, %v941_v14  ;;  %1126 = vmatpush1.bf16.msra.mxu0 %v1098_v13 }
 0x2a9   : > { %v961_v18 = vpop.permute.xlu0 %960  ;;  %v959_v19 = vpop.permute.xlu1 %958  ;;  %v1076_v21 = vld [vmem:[#allocation2 + $0x28] sm:$0xff] }
 0x2aa   : > { %969 = vst.msk [vmem:[#allocation2 + $0x58] sm:$0xff] %vm536_vm0, %v961_v18  ;;  %v962_v22 = vsel %vm592_vm4, %v957_v2, %v959_v19  ;;  %v963_v23 = vsel %vm592_vm4, %v959_v19, %v961_v18  ;;  %v1100_v24 = vpack.c.bf16 %v1076_v21, %v1073_v20  ;;  %vm1307_vm4 = vcmask 130048  }
 0x2ab   : > { %v1102_v25 = vpack.c.bf16 %v963_v23, %v943_v17  ;;  %v1101_v26 = vpack.c.bf16 %v962_v22, %v942_v16 }
 0x2ac   : > { %1633 = vmatpush3.bf16.msra.mxu1 %v1100_v24 }
 0x2ad   : > { %v981_v27 = vpop.permute.xlu0 %980  ;;  %v979_v28 = vpop.permute.xlu1 %978  ;;  %1634 = vmatprep.subr.bf16.mxu1 %v1792_v5  ;;  %1127 = vmatprep.subr.bf16.mxu0 %v1102_v25  ;;  %v1079_v35 = vld [vmem:[#allocation2 + $0x40] sm:$0xff] }
 0x2ae   : > { %989 = vst.msk [vmem:[#allocation2 + $0x70] sm:$0xff] %vm536_vm0, %v981_v27  ;;  %v982_v29 = vsel %vm613_vm5, %v977_v63, %v979_v28  ;;  %v983_v30 = vsel %vm613_vm5, %v979_v28, %v981_v27  ;;  %1128 = vmatpush1.bf16.msra.mxu0 %v1101_v26 }
 0x2b1   : > { %v1001_v32 = vpop.permute.xlu0 %1000  ;;  %v999_v34 = vpop.permute.xlu1 %998  ;;  %v1082_v36 = vld [vmem:[#allocation2 + $0x58] sm:$0xff] }
 0x2b2   : > { %1009 = vst.msk [vmem:[#allocation2 + $0x88] sm:$0xff] %vm536_vm0, %v1001_v32  ;;  %v1002_v37 = vsel %vm634_vm6, %v997_v0, %v999_v34  ;;  %v1003_v38 = vsel %vm634_vm6, %v999_v34, %v1001_v32  ;;  %v1103_v39 = vpack.c.bf16 %v1082_v36, %v1079_v35  ;;  %v1070_v0 = vld [vmem:[%s2291_s5] sm:$0xf] }
 0x2b3   : > { %v1105_v40 = vpack.c.bf16 %v1003_v38, %v983_v30  ;;  %v1104_v41 = vpack.c.bf16 %v1002_v37, %v982_v29 }
 0x2b4   : > { %1635 = vmatpush3.bf16.msra.mxu1 %v1103_v39 }
 0x2b5   : > { %v1021_v42 = vpop.permute.xlu0 %1020  ;;  %v1019_v43 = vpop.permute.xlu1 %1018  ;;  %1636 = vmatprep.subr.bf16.mxu1 %v1792_v5  ;;  %1129 = vmatprep.subr.bf16.mxu0 %v1105_v40  ;;  %v1085_v49 = vld [vmem:[#allocation2 + $0x70] sm:$0xff]  ;;  %v1360_v40 = vld [vmem:[%s2294_s8] sm:$0xf] }
 0x2b6   : > { %1029 = vst.msk [vmem:[#allocation2 + $0xa0] sm:$0xff] %vm536_vm0, %v1021_v42  ;;  %v1022_v45 = vsel %vm655_vm7, %v1017_v1, %v1019_v43  ;;  %v1023_v46 = vsel %vm655_vm7, %v1019_v43, %v1021_v42  ;;  %1130 = vmatpush1.bf16.msra.mxu0 %v1104_v41  ;;  %v1236_v41 = vld [vmem:[%s2298_s12] sm:$0xff]  ;;  %v1592_v43 = vld [vmem:[#allocation4] ss:$0 sm:$0xff] }
 0x2b9   : > { %v1041_v47 = vpop.permute.xlu0 %1040  ;;  %v1039_v48 = vpop.permute.xlu1 %1038  ;;  %v1088_v50 = vld [vmem:[#allocation2 + $0x88] sm:$0xff] }
 0x2ba   : > { %1049 = vst.msk [vmem:[#allocation2 + $0xb8] sm:$0xff] %vm536_vm0, %v1041_v47  ;;  %v1042_v51 = vsel %vm676_vm8, %v1037_v7, %v1039_v48  ;;  %v1043_v52 = vsel %vm676_vm8, %v1039_v48, %v1041_v47  ;;  %v1106_v53 = vpack.c.bf16 %v1088_v50, %v1085_v49 }
 0x2bb   : > { %v1108_v54 = vpack.c.bf16 %v1043_v52, %v1023_v46  ;;  %v1107_v55 = vpack.c.bf16 %v1042_v51, %v1022_v45  ;;  %v1237_v45 = vld [vmem:[%s2298_s12 + $0x8] sm:$0xff] }
 0x2bc   : > { %1637 = vmatpush3.bf16.msra.mxu1 %v1106_v53 }
 0x2bd   : > { %v1059_v56 = vpop.permute.xlu0 %1058  ;;  %v1061_v57 = vpop.permute.xlu1 %1060  ;;  %1638 = vmatprep.subr.bf16.mxu1 %v1792_v5  ;;  %1131 = vmatprep.subr.bf16.mxu0 %v1108_v54  ;;  %v1091_v61 = vld [vmem:[#allocation2 + $0xa0] sm:$0xff] }
 0x2be   : > { %v1062_v58 = vsel %vm697_vm9, %v2139_v4, %v1059_v56  ;;  %v1063_v59 = vsel %vm697_vm9, %v1059_v56, %v1061_v57  ;;  %1069 = vst.msk [vmem:[#allocation2 + $0xd0] sm:$0xff] %vm536_vm0, %v1061_v57  ;;  %1132 = vmatpush1.bf16.msra.mxu0 %v1107_v55  ;;  %v1304_v57 = vld [vmem:[%s2300_s14] sm:$0xf] }
 0x2bf   : > { %v1111_v60 = vpack.c.bf16 %v1063_v59, %v1063_v59  ;;  %v1110_v3 = vpack.c.bf16 %v1062_v58, %v1062_v58 }
 0x2c1   : > { %v1094_v62 = vld [vmem:[#allocation2 + $0xb8] sm:$0xff]  ;;  %1587 = vmatprep.subr.msk.bf16.mxu0 %vm753_vm10, %v1111_v60  ;;  %v1117_v2 = vsel %vm753_vm10, %v1110_v3, 0  ;;  %v1306_v3 = vld [vmem:[%s2301_s15] sm:$0xff] }
 0x2c2   : > { %v1109_v63 = vpack.c.bf16 %v1094_v62, %v1091_v61  ;;  %1134 = vmatpush1.bf16.msra.mxu0 %v1117_v2 }
 0x2c3   : > { %1646 = vmatprep.subr.bf16.mxu0 %v1792_v5 }
 0x2c4   : > { %1639 = vmatpush3.bf16.msra.mxu1 %v1109_v63 }
 0x2c5   : > { %1640 = vmatprep.subr.bf16.mxu1 %v1792_v5  ;;  %v1097_v1 = vld [vmem:[#allocation2 + $0xd0] sm:$0xff]  ;;  %1588 = vmatmul.mubr.msk.bf16.vlgmr.msra.gmra.mrb[4].mxu0 %vm749_vm11, %v1070_v0 }
 0x2c6   : > { %v1112_v7 = vpack.c.bf16 %v1097_v1, %v1097_v1  ;;  %1648 = vmatprep.mubr.msk.bf16.mxu0 %vm1801_vm1, %v1792_v5 }
 0x2c8   : > { %v1123_v4 = vsel %vm753_vm10, %v1112_v7, 0 }
 0x2c9   : > { %1641 = vmatpush3.bf16.msra.mxu1 %v1123_v4 }
 0x2ca   : > { %1652 = vmatprep.subr.bf16.mxu1 %v1792_v5 }
 0x2cc   : > { %1643 = vmatmul.mubr.msk.bf16.vlgmr.msra.gmra.mrb[4].mxu1 %vm749_vm11, %v1070_v0 }
 0x2cd   : > { %1654 = vmatprep.mubr.msk.bf16.mxu1 %vm1801_vm1, %v1792_v5 }
 0x2ce   : > { %v1210_v8 = vpop.permute.xlu0 %1209  ;;  %v1219_v15 = vpop.permute.xlu1 %1218 }
 0x2d2   : > { %v1368_v30 = vpop.permute.xlu1 %1367 }
 0x2d6   : > { %v1370_v32 = vpop.permute.xlu1 %1369 }
 0x398   : > { %v1159_v9 = vpop.f32.mrb[4].mxu0 }
 0x399   : > { %v1212_v10 = vmul.f32 %v1210_v8, %v1159_v9  ;;  %v1161_v11 = vpop.f32.mrb[5].mxu0 }
 0x39a   : > { %v1213_v12 = vmul.f32 %v1210_v8, %v1161_v11  ;;  %v1163_v13 = vpop.f32.mrb[6].mxu0 }
 0x39b   : > { %v1164_v14 = vpop.f32.mrb[7].mxu0  ;;  %v2186_v16 = vadd.f32 %v1219_v15, %v1212_v10 }
 0x39c   : > { %v2188_v17 = vadd.f32 %v1219_v15, %v1213_v12 }
 0x39d   : > { %v1224_v21 = vmul.f32 %v2186_v16, %v2064_v31  ;;  %v1372_v31 = vpop.permute.xlu1 %1371 }
 0x39e   : > { %v1225_v22 = vmul.f32 %v2188_v17, %v2066_v33  ;;  %v1374_v33 = vsel %vm613_vm5, %v1368_v30, %v1370_v32  ;;  %v1375_v37 = vsel %vm613_vm5, %v1370_v32, %v1372_v31  ;;  %v1386_v59 = vsel %vm753_vm10, %v1372_v31, 0 }
 0x39f   : > { %v1200_v18 = vpop.f32.mrb[4].mxu1  ;;  %v1380_v39 = vsel %vm753_vm10, %v1374_v33, 0 }
 0x3a0   : > { %v1214_v19 = vmul.f32 %v1210_v8, %v1200_v18  ;;  %v1644_v20 = vpop.f32.mrb[5].mxu1  ;;  %v1227_v27 = vadd.f32 %v1225_v22, %v1224_v21 }
 0x3a1   : > { %v1203_v23 = vpop.f32.mrb[6].mxu1  ;;  %v1473_v13 = vpop.permute.xlu1 %1472 }
 0x3a2   : > { %v2194_v24 = vadd.f32 %v1219_v15, %v1214_v19  ;;  %v1645_v25 = vpop.f32.mrb[7].mxu1 }
 0x3a4   : > { %v1226_v26 = vmul.f32 %v2194_v24, %v2070_v44  ;;  %v1721_v44 = vld [vmem:[%s2297_s11] sm:$0xff]  }
 0x3a5   : > { %v1482_v14 = vpop.permute.xlu1 %1481 }
 0x3a6   : > { %v1228_v28 = vsel %vm536_vm0, %v1226_v26, 0.0 }
 0x3a7   : > { %v1229_v29 = vadd.f32 %v1228_v28, %v1227_v27 }
 0x3a9   : > { %1230 = vadd.xlane.f32.xlu0 %v1229_v29 }
 0x436   : > { %v1231_v34 = vpop.xlane.xlu0 %1230 }
 0x437   : > { %v1232_v35 = vmul.f32 0.00390625, %v1231_v34 }
 0x439   : > { %v1235_v36 = vpack.c.bf16 %v1232_v35, %v1232_v35 }
 0x43b   : > { %v1248_v38 = vsel %vm753_vm10, %v1235_v36, 0 }
 0x43c   : > { %1647 = vmatpush3.bf16.msra.mxu0 %v1248_v38 }
 0x43d   : > { %1594 = vmatprep.subr.msk.bf16.mxu0 %vm753_vm10, %v1375_v37 }
 0x43f   : > { %1649 = vmatmul.mubr.msk.bf16.vlgmr.msra.gmra.mrb[8].mxu0 %vm1243_vm15, %v1721_v44 }
 0x440   : > { %1389 = vmatpush1.bf16.msra.mxu0 %v1380_v39  ;;  %1420 = vmatprep.mubr.bf16.mxu0 %v1799_v6 }
 0x447   : > { %1595 = vmatmul.mubr.msk.bf16.vlgmr.msra.gmra.mrb[12].mxu0 %vm1243_vm15, %v1360_v40 }
 0x512   : > { %v1284_v42 = vpop.f32.mrb[8].mxu0 }
 0x513   : > { %v1285_v46 = vadd.f32 %v1284_v42, %v1236_v41  ;;  %v1650_v47 = vpop.f32.mrb[9].mxu0 }
 0x514   : > { %v1287_v48 = vpop.f32.mrb[10].mxu0 }
 0x515   : > { %v1300_v6 = vmul.f32 %v1592_v43, %v1285_v46  ;;  %v1288_v49 = vadd.f32 %v1287_v48, %v1237_v45  ;;  %v1651_v50 = vpop.f32.mrb[11].mxu0  ;;  %vm1291_vm2 = vcmp.gt.f32.partialorder %v1285_v46, 0.0 }
 0x517   : > { %vm1292_vm3 = vcmp.gt.f32.partialorder %v1288_v49, 0.0  ;;  %v1301_v51 = vmul.f32 %v1592_v43, %v1288_v49  ;;  %v1302_v52 = vsel %vm1291_vm2, %v1285_v46, %v1300_v6 }
 0x519   : > { %v1303_v53 = vsel %vm1292_vm3, %v1288_v49, %v1301_v51 }
 0x51a   : > { %v1305_v54 = vpack.c.bf16 %v1303_v53, %v1302_v52  ;;  %v1422_v55 = vpop.f32.mrb[12].mxu0 }
 0x51b   : > { %v1424_v56 = vpop.f32.mrb[13].mxu0  ;;  %v1475_v15 = vmul.f32 %v1473_v13, %v1422_v55 }
 0x51c   : > { %1653 = vmatpush3.bf16.msra.mxu1 %v1305_v54  ;;  %v1426_v58 = vpop.f32.mrb[14].mxu0  ;;  %v1476_v18 = vmul.f32 %v1473_v13, %v1424_v56 }
 0x51d   : > { %1658 = vmatprep.subr.bf16.mxu1 %v1792_v5  ;;  %v1427_v60 = vpop.f32.mrb[15].mxu0  ;;  %v1484_v20 = vadd.f32 %v1482_v14, %v1475_v15 }
 0x51e   : > { %v1485_v21 = vadd.f32 %v1482_v14, %v1476_v18 }
 0x51f   : > { %1655 = vmatmul.mubr.msk.bf16.vlgmr.msra.gmra.mrb[8].mxu1 %vm1307_vm4, %v1304_v57 }
 0x520   : > { %1659 = vmatpush3.bf16.msra.mxu1 %v1386_v59  ;;  %1660 = vmatprep.mubr.msk.bf16.mxu1 %vm1801_vm1, %v1792_v5 }
 0x527   : > { %1661 = vmatmul.mubr.msk.bf16.vlgmr.msra.gmra.mrb[12].mxu1 %vm1243_vm15, %v1360_v40 }
 0x5f2   : > { %v1345_v61 = vpop.f32.mrb[8].mxu1 }
 0x5f3   : > { %v1346_v62 = vadd.f32 %v1345_v61, %v1306_v3  ;;  %v1656_v2 = vpop.f32.mrb[9].mxu1 }
 0x5f4   : > { %v1348_v63 = vpop.f32.mrb[10].mxu1 }
 0x5f5   : > { %v1351_v0 = vsub.f32 0.0, %v1346_v62  ;;  %v1657_v1 = vpop.f32.mrb[11].mxu1 }
 0x5f7   : > { %v1352_v7 = vmul.f32 1.442695, %v1351_v0 }
 0x5f9   : > { %1722 = vpow2.f32 %v1352_v7 }
 0x5fa   : > { %v1463_v4 = vpop.f32.mrb[12].mxu1 }
 0x5fb   : > { %v1662_v8 = vpop.f32.mrb[13].mxu1  ;;  %v1477_v19 = vmul.f32 %v1473_v13, %v1463_v4 }
 0x5fc   : > { %v1466_v9 = vpop.f32.mrb[14].mxu1 }
 0x5fd   : > { %v1663_v10 = vpop.f32.mrb[15].mxu1  ;;  %v1486_v23 = vadd.f32 %v1482_v14, %v1477_v19 }
 0x603   : > { %v1723_v11 = vpop.eup %1722 }
 0x604   : > { %v1354_v5 = vadd.f32 1.0, %v1723_v11 }
 0x606   : > { %1724 = vrcp.f32 %v1354_v5 }
 0x610   : > { %v1725_v12 = vpop.eup %1724 }
 0x611   : > { %1489 = vperm.xlu1 %1720, %v1725_v12  }
 0x690   : > { %v1490_v22 = vpop.permute.xlu1 %1489 }
 0x691   : > { %v1492_v25 = vmul.f32 %v1490_v22, %v2186_v16  ;;  %v1493_v26 = vmul.f32 %v1490_v22, %v2188_v17  ;;  %v1494_v27 = vmul.f32 %v1490_v22, %v2194_v24 }
 0x693   : > { %v1495_v28 = vadd.f32 %v1492_v25, %v1484_v20  ;;  %v1496_v29 = vadd.f32 %v1493_v26, %v1485_v21  ;;  %v1497_v30 = vadd.f32 %v1494_v27, %v1486_v23 }
 0x695   : > { %v1498_v32 = vmax.f32 %v1495_v28, 0.0  ;;  %v1499_v34 = vmax.f32 %v1496_v29, 0.0  ;;  %v1500_v35 = vmax.f32 %v1497_v30, 0.0 }
 0x697   : > { %1501 = vst [vmem:[%s1948_s25] sm:$0xff] %v1498_v32  ;;  %1502 = vst [vmem:[%s1948_s25 + $0x8] sm:$0xff] %v1499_v34 }
 0x698   : > { %1503 = vst.msk [vmem:[%s1948_s25 + $0x10] sm:$0xff] %vm536_vm0, %v1500_v35 }
 0x699   : > { %1739 = shalt.err (!%p1736_p4)
}
 0x69a   : > { %s1740_s25 = scalar_lea.hbm %s2238_s22, 384  ;;  %s1744_s27 = scalar_lea.hbm %s2302_s16, 768 }
 0x69b   : > { %p1741_p7 = scmp.ne.s32.totalorder %s2238_s22, %s1740_s25  ;;  %p1745_p10 = scmp.lt.u32.totalorder %s2238_s22, %s2302_s16 }
 0x69c   : > { %p1746_p11 = scmp.lt.u32.totalorder %s1744_s27, %s1740_s25  ;;  %p1748_p13 = scmp.lt.u32.totalorder %s1740_s25, %s2238_s22 }
 0x69d   : > { %p1742_p8 = pnand %p1741_p7, %p1930_p5 }
 0x69e   : > { %p1747_p12 = por %p1746_p11, %p1745_p10 }
 0x69f   : > { %p1743_p9 = pneg %p1742_p8 }
 0x6a0   : > { %p1749_p0 = por %p1748_p13, %p1747_p12 }
 0x6a2   : > { %p1750_p1 = pnand %p1749_p0, %p1743_p9 }
 0x6a4   : > { %1753 = shalt.err (!%p1750_p1)
}
 0x6a5   : > { %1667 = dma.vmem_to_hbm [thread:$0]  (%p1930_p5), %s2240_s19, 384, %s2238_s22, %s1505_s29  }
 0x6a6 PF: > { %p1673_p2 = scmp.ge.s32.totalorder %s1788_s26, 2  ;;  %s1531_s30 = sand.u32 1, %s1776_s23  }
 0x6a7   : > { %s1532_s1 = scalar_lea.sflag [#allocation6], %s1531_s30 }
 0x6a8   : > { %p1670_p3 = pnand %p1673_p2, %p1934_p6 }
 0x6aa   : > { %1771 = dma.done.wait (!%p1670_p3), %s1532_s1, 384  }
 0x6ab   : > { %1773 = vsyncadd (!%p1670_p3), %s1532_s1, 4294966912  ;;  %s2326_s21 = sld [smem:[#allocation8_spill]]  ;;  %s2327_s25 = sld [smem:[#allocation9_spill]] }
 0x6ac   : > { %p28_p4 = scmp.ge.s32.totalorder %s1917_s28, 4   ;;  %s2328_s23 = smov %s1780_s24 }
 0x6ad   : > { %s2330_s26 = smov %s1917_s28 }
 0x6ae   :  { %30 = sbr.rel (!%p28_p4) target bundleno = 6 (0x6), region = 123 }
 0x6b1   : > { %s2329_s24 = smov %s2326_s21 }
 0x6b5   :  { %1537 = vsyncpa [#allocation6], 1 }
 0x6b6   :  { %1539 = vsyncpa [#allocation6 + $0x1], 1 }

</bundles_post_ra>
